<compile_context>
chip_gen: v6e
topology: v6e:2x2x1
jax: 0.10.0
libtpu: 0.0.40
codegen_flags: <defaults>
</compile_context>

<pallas_src>
import math
import numpy as np
import jax
import jax.numpy as jnp
from jax.experimental import pallas as pl
from jax.experimental.pallas import tpu as pltpu  # noqa: F401  (TPU backend import)

# ---------------- config (stand-in for `cfg`) ----------------
MAX_LEN = 8          # cfg.MAX_LEN
OUTPUT_DIM = 16      # cfg.OUTPUT_DIM
EMBED_DIM = 32       # embed_dim
NHEAD = 4            # nhead
D_HID = 64           # d_hid
NLAYERS = 2          # nlayers
VOCAB = 16           # len(token_mapping)
LN_EPS = 1e-5
BATCH = 2
HEAD_DIM = EMBED_DIM // NHEAD

BS = BATCH * MAX_LEN            # 16  activation rows (b*S + s)
GR = BATCH * NHEAD * MAX_LEN    # 64  packed (batch, head, seq) rows
SO = MAX_LEN * OUTPUT_DIM       # 128 classifier per-position logit lanes
OUT_ROWS = 8                    # padded output rows (unmasked store)
OUT_PAD = 128                   # padded output lanes (lane-dense store)
NEG = -1e30                     # additive "-inf" (PyTorch uses -inf; see notes)


# ---------------- static slab layout (shape math only, computed at import) -----------
def _slab_layout():
    E, S, L = EMBED_DIM, MAX_LEN, NLAYERS
    entries = [
        ("emb_table", (VOCAB + 2, E)),      # [token_embed; type_embed]
        ("rep", (GR, BS)),                  # row replication (b,s) -> (b,h,s)
        ("collapse", (BS, GR)),             # rep^T: sum head replicas back
        ("headmask", (GR, E)),              # per-replica head lane mask
        ("blkmask", (GR, GR)),              # block-diagonal additive mask
        ("w3all", (E, SO)),                 # classifier weight, lanes = s*O + o
        ("sums", (SO, OUT_PAD)),            # picks o from (s, o) lanes
        ("collect", (OUT_ROWS, BS)),        # sums positions per batch row
        ("diagmask", (BS, SO)),             # keeps only s == row position
        ("pe", (BS, E)),                    # positional encoding, pre-tiled over batch
        ("embln_w", (1, E)), ("embln_b", (1, E)),
        ("cls_b", (1, OUT_PAD)),
    ]
    for l in range(L):
        entries += [
            (f"wqkv{l}", (E, 3 * E)), (f"bqkv{l}", (1, 3 * E)),
            (f"wout{l}", (E, E)), (f"bout{l}", (1, E)),
            (f"ln1w{l}", (1, E)), (f"ln1b{l}", (1, E)),
            (f"w1{l}", (E, D_HID)), (f"b1{l}", (1, D_HID)),
            (f"w2{l}", (D_HID, E)), (f"b2{l}", (1, E)),
            (f"ln2w{l}", (1, E)), (f"ln2b{l}", (1, E)),
        ]
    offsets, row = {}, 0
    for name, shape in entries:
        offsets[name] = (row, shape)
        row += ((shape[0] + 7) // 8) * 8    # 8-sublane aligned sections
    return offsets, row


SLAB_OFF, SLAB_ROWS = _slab_layout()        # SLAB_ROWS == 904  (~452 KiB)


def _static_constants():
    S, H, dh, E, O = MAX_LEN, NHEAD, HEAD_DIM, EMBED_DIM, OUTPUT_DIM
    g = np.arange(GR) // S                  # (batch*H + head) group of packed row
    s = np.arange(GR) % S
    b = g // H
    h = g % H
    rep = np.zeros((GR, BS), np.float32)
    rep[np.arange(GR), b * S + s] = 1.0
    collapse = rep.T.copy()
    headmask = (np.arange(E)[None, :] // dh == h[:, None]).astype(np.float32)
    blkmask = np.where(g[:, None] == g[None, :], 0.0, NEG).astype(np.float32)
    diagmask = ((np.arange(SO)[None, :] // O) ==
                (np.arange(BS)[:, None] % S)).astype(np.float32)
    sums = np.zeros((SO, OUT_PAD), np.float32)
    sums[np.arange(SO), np.arange(SO) % O] = 1.0
    collect = np.zeros((OUT_ROWS, BS), np.float32)
    for r in range(BATCH):
        collect[r, r * S:(r + 1) * S] = 1.0
    return dict(rep=rep, collapse=collapse, headmask=headmask, blkmask=blkmask,
                diagmask=diagmask, sums=sums, collect=collect)


# ---------------- fused kernel --------------------------------------------------------
def _g(slab_ref, name):
    r0, (nr, nc) = SLAB_OFF[name]
    return slab_ref[r0:r0 + nr, 0:nc]


def _layernorm(x, w, b):
    mu = jnp.mean(x, axis=-1, keepdims=True)
    var = jnp.mean((x - mu) ** 2, axis=-1, keepdims=True)
    return (x - mu) * jax.lax.rsqrt(var + LN_EPS) * w + b


def fused_transformer_kernel(ids_ref, bias_ref, slab_ref, o_ref):
    E = EMBED_DIM
    f32 = jnp.float32

    # ---- embeddings: ONE fused one-hot matmul over [token_table; type_table] ----
    ids = ids_ref[...]                                              # (BS, 2) int32
    cols = jax.lax.broadcasted_iota(jnp.int32, (BS, VOCAB + 2), 1)
    onehot = ((cols == ids[:, 0:1]) |
              (cols == (ids[:, 1:2] + VOCAB))).astype(f32)          # (BS, VOCAB+2)
    emb = jnp.dot(onehot, _g(slab_ref, "emb_table"), preferred_element_type=f32)

    # Embedder: LayerNorm (weights pre-scaled by sqrt(E)) + pre-tiled positional enc.
    x = _layernorm(emb, _g(slab_ref, "embln_w"), _g(slab_ref, "embln_b")) \
        + _g(slab_ref, "pe")                                        # (BS, E)

    # Shared attention constants (loaded once, reused by both layers)
    rep_m = _g(slab_ref, "rep")                                     # (GR, BS)
    col_m = _g(slab_ref, "collapse")                                # (BS, GR)
    head_m = _g(slab_ref, "headmask")                               # (GR, E)
    # additive score mask: block-diag(-inf off diagonal (batch,head) blocks) + key-pad bias
    col_bias = jnp.dot(bias_ref[...], col_m, preferred_element_type=f32)   # (1, GR)
    mask = _g(slab_ref, "blkmask") + col_bias                               # (GR, GR)

    # ---- NLAYERS post-LN TransformerEncoderLayers (static unroll) ----
    for l in range(NLAYERS):
        # fused QKV projection over all B*S rows (1/sqrt(dh) folded into Q weights)
        qkv = jnp.dot(x, _g(slab_ref, f"wqkv{l}"), preferred_element_type=f32) \
            + _g(slab_ref, f"bqkv{l}")                              # (BS, 3E)
        qkv_rep = jnp.dot(rep_m, qkv, preferred_element_type=f32)   # (GR, 3E)
        q = qkv_rep[:, 0:E] * head_m                                # head-select Q lanes
        k = qkv_rep[:, E:2 * E]                                     # K left unmasked
        v = qkv_rep[:, 2 * E:3 * E] * head_m                        # head-select V lanes

        # single block-diagonal score matmul for all (batch, head) pairs
        s = jax.lax.dot_general(q, k, (((1,), (1,)), ((), ())),
                                preferred_element_type=f32) + mask  # (GR, GR)
        s = s - jnp.max(s, axis=-1, keepdims=True)
        pr = jnp.exp(s)
        pr = pr * pl.reciprocal(jnp.sum(pr, axis=-1, keepdims=True), approx=True)
        o = jnp.dot(pr, v, preferred_element_type=f32)              # (GR, E)

        # collapse head replicas (disjoint lanes) and out-project all rows at once
        attn = jnp.dot(col_m, o, preferred_element_type=f32)        # (BS, E)
        attn = jnp.dot(attn, _g(slab_ref, f"wout{l}"),
                       preferred_element_type=f32) + _g(slab_ref, f"bout{l}")

        # residual + LN1, FFN (ReLU), residual + LN2  (dropout = identity)
        x1 = _layernorm(x + attn, _g(slab_ref, f"ln1w{l}"), _g(slab_ref, f"ln1b{l}"))
        ff = jnp.maximum(
            jnp.dot(x1, _g(slab_ref, f"w1{l}"), preferred_element_type=f32)
            + _g(slab_ref, f"b1{l}"), 0.0)
        ff = jnp.dot(ff, _g(slab_ref, f"w2{l}"),
                     preferred_element_type=f32) + _g(slab_ref, f"b2{l}")
        x = _layernorm(x1 + ff, _g(slab_ref, f"ln2w{l}"), _g(slab_ref, f"ln2b{l}"))

    # ---- classifier: Flatten + Linear as masked matmuls (no in-kernel reshape) ----
    z = jnp.dot(x, _g(slab_ref, "w3all"), preferred_element_type=f32)   # (BS, S*O)
    z = z * _g(slab_ref, "diagmask")
    zd = jnp.dot(z, _g(slab_ref, "sums"), preferred_element_type=f32)   # (BS, OUT_PAD)
    logits = jnp.dot(_g(slab_ref, "collect"), zd,
                     preferred_element_type=f32) + _g(slab_ref, "cls_b")  # (8, 128)

    # F.normalize(p=2, dim=1): exact rsqrt (pad lanes are zero; pad rows sliced outside)
    ssq = jnp.sum(logits * logits, axis=-1, keepdims=True)
    o_ref[...] = logits * jax.lax.rsqrt(jnp.maximum(ssq, 1e-24))


# ---------------- parameter init (natural shapes, deterministic) ----------------------
def init_params(key):
    def nrm(k, shape, scale=0.02):
        return (scale * jax.random.normal(k, shape)).astype(jnp.float32)

    keys = iter(jax.random.split(key, 40))
    E, S, O, L = EMBED_DIM, MAX_LEN, OUTPUT_DIM, NLAYERS

    p = {
        "token_embed": nrm(next(keys), (VOCAB, E), 1.0),
        "type_embed": nrm(next(keys), (2, E), 1.0),
        "emb_ln_w": jnp.ones((E,), jnp.float32),
        "emb_ln_b": jnp.zeros((E,), jnp.float32),
        "cls_w": nrm(next(keys), (S * E, O)),      # flat index = s*E + e (Flatten order)
        "cls_b": nrm(next(keys), (O,)),
    }
    # sinusoidal positional encoding (first MAX_LEN rows)
    position = jnp.arange(S, dtype=jnp.float32)[:, None]
    div_term = jnp.exp(jnp.arange(0, E, 2, dtype=jnp.float32)
                       * (-math.log(10000.0) / E))
    pe = jnp.zeros((S, E), jnp.float32)
    pe = pe.at[:, 0::2].set(jnp.sin(position * div_term))
    pe = pe.at[:, 1::2].set(jnp.cos(position * div_term))
    p["pe"] = pe

    p["wqkv"] = jnp.stack([nrm(next(keys), (E, 3 * E)) for _ in range(L)])
    p["bqkv"] = jnp.stack([nrm(next(keys), (3 * E,)) for _ in range(L)])
    p["wout"] = jnp.stack([nrm(next(keys), (E, E)) for _ in range(L)])
    p["bout"] = jnp.stack([nrm(next(keys), (E,)) for _ in range(L)])
    p["ln1w"] = jnp.ones((L, E), jnp.float32)
    p["ln1b"] = jnp.zeros((L, E), jnp.float32)
    p["w1"] = jnp.stack([nrm(next(keys), (E, D_HID)) for _ in range(L)])
    p["b1"] = jnp.stack([nrm(next(keys), (D_HID,)) for _ in range(L)])
    p["w2"] = jnp.stack([nrm(next(keys), (D_HID, E)) for _ in range(L)])
    p["b2"] = jnp.stack([nrm(next(keys), (E,)) for _ in range(L)])
    p["ln2w"] = jnp.ones((L, E), jnp.float32)
    p["ln2b"] = jnp.zeros((L, E), jnp.float32)
    return p


# ---------------- pack all params + static constants into one (SLAB_ROWS,128) slab ----
def build_slab(p):
    E, S, O, L, dh = EMBED_DIM, MAX_LEN, OUTPUT_DIM, NLAYERS, HEAD_DIM
    vals = dict(_static_constants())
    vals["emb_table"] = jnp.concatenate([p["token_embed"], p["type_embed"]], axis=0)
    vals["embln_w"] = (p["emb_ln_w"] * math.sqrt(E)).reshape(1, E)   # fold * sqrt(E)
    vals["embln_b"] = (p["emb_ln_b"] * math.sqrt(E)).reshape(1, E)
    vals["pe"] = jnp.tile(p["pe"], (BATCH, 1))                       # pre-tiled over batch
    vals["w3all"] = p["cls_w"].reshape(S, E, O).transpose(1, 0, 2).reshape(E, S * O)
    vals["cls_b"] = jnp.pad(p["cls_b"].reshape(1, O), ((0, 0), (0, OUT_PAD - O)))
    scale = 1.0 / math.sqrt(dh)
    for l in range(L):
        vals[f"wqkv{l}"] = p["wqkv"][l].at[:, :E].multiply(scale)    # fold 1/sqrt(dh)
        vals[f"bqkv{l}"] = p["bqkv"][l].at[:E].multiply(scale).reshape(1, 3 * E)
        vals[f"wout{l}"] = p["wout"][l]
        vals[f"bout{l}"] = p["bout"][l].reshape(1, E)
        vals[f"ln1w{l}"] = p["ln1w"][l].reshape(1, E)
        vals[f"ln1b{l}"] = p["ln1b"][l].reshape(1, E)
        vals[f"w1{l}"] = p["w1"][l]
        vals[f"b1{l}"] = p["b1"][l].reshape(1, D_HID)
        vals[f"w2{l}"] = p["w2"][l]
        vals[f"b2{l}"] = p["b2"][l].reshape(1, E)
        vals[f"ln2w{l}"] = p["ln2w"][l].reshape(1, E)
        vals[f"ln2b{l}"] = p["ln2b"][l].reshape(1, E)
    slab = jnp.zeros((SLAB_ROWS, 128), jnp.float32)
    for name, arr in vals.items():
        r0, (nr, nc) = SLAB_OFF[name]
        slab = slab.at[r0:r0 + nr, 0:nc].set(jnp.asarray(arr, jnp.float32))
    return slab


# ---------------- full forward: one fused pallas_call ---------------------------------
@jax.jit
def transformer_forward(tokens, key_padding_mask, token_type, slab):
    ids = jnp.stack([tokens.reshape(-1), token_type.reshape(-1)], axis=1).astype(jnp.int32)
    # key padding mask (True = padded) -> additive attention bias, flattened to (1, B*S)
    bias = jnp.where(key_padding_mask, NEG, 0.0).astype(jnp.float32).reshape(1, BS)
    out = pl.pallas_call(
        fused_transformer_kernel,
        out_shape=jax.ShapeDtypeStruct((OUT_ROWS, OUT_PAD), jnp.float32),
    )(ids, bias, slab)
    return out[:BATCH, :OUTPUT_DIM]


# ---------------- pure-JAX reference (PyTorch-equivalent math) ------------------------
def reference_forward(tokens, key_padding_mask, token_type, p):
    B, S = tokens.shape
    E, H, dh = EMBED_DIM, NHEAD, HEAD_DIM

    def ln(x, w, b):
        mu = jnp.mean(x, axis=-1, keepdims=True)
        var = jnp.mean((x - mu) ** 2, axis=-1, keepdims=True)
        return (x - mu) * jax.lax.rsqrt(var + LN_EPS) * w + b

    emb = p["token_embed"][tokens] + p["type_embed"][token_type]
    x = ln(emb, p["emb_ln_w"], p["emb_ln_b"]) * math.sqrt(E) + p["pe"][None]
    bias = jnp.where(key_padding_mask, NEG, 0.0)[:, None, None, :]
    for l in range(NLAYERS):
        qkv = x @ p["wqkv"][l] + p["bqkv"][l]
        q, k, v = jnp.split(qkv, 3, axis=-1)
        q = q.reshape(B, S, H, dh).transpose(0, 2, 1, 3)
        k = k.reshape(B, S, H, dh).transpose(0, 2, 1, 3)
        v = v.reshape(B, S, H, dh).transpose(0, 2, 1, 3)
        s = q @ k.transpose(0, 1, 3, 2) / math.sqrt(dh) + bias
        pr = jax.nn.softmax(s, axis=-1)
        o = (pr @ v).transpose(0, 2, 1, 3).reshape(B, S, E)
        attn = o @ p["wout"][l] + p["bout"][l]
        x1 = ln(x + attn, p["ln1w"][l], p["ln1b"][l])
        ff = jnp.maximum(x1 @ p["w1"][l] + p["b1"][l], 0.0) @ p["w2"][l] + p["b2"][l]
        x = ln(x1 + ff, p["ln2w"][l], p["ln2b"][l])
    logits = x.reshape(B, S * E) @ p["cls_w"] + p["cls_b"]
    nrm = jnp.maximum(jnp.linalg.norm(logits, axis=-1, keepdims=True), 1e-12)
    return logits / nrm


if __name__ == "__main__":
    root = jax.random.PRNGKey(0)
    kp, kt, ky = jax.random.split(root, 3)

    params = init_params(kp)
    slab = build_slab(params)

    tokens = jax.random.randint(kt, (BATCH, MAX_LEN), 0, VOCAB, dtype=jnp.int32)
    token_type = jax.random.randint(ky, (BATCH, MAX_LEN), 0, 2, dtype=jnp.int32)
    # src_key_padding_mask: True marks padded positions (pad the tail of batch element 1)
    mask = jnp.zeros((BATCH, MAX_LEN), dtype=bool).at[1, -2:].set(True)

    out = transformer_forward(tokens, mask, token_type, slab)
    out = jax.block_until_ready(out)

    assert out.shape == (BATCH, OUTPUT_DIM)
    assert bool(jnp.all(jnp.isfinite(out)))

    ref = reference_forward(tokens, mask, token_type, params)
    err = float(jnp.max(jnp.abs(out - ref)))
    assert err < 5e-3, f"kernel/reference mismatch: max abs err {err}"

    print("KERNEL_OK")
</pallas_src>

<mosaic_0001>
module attributes {stable_mosaic.version = 11 : i64} {
  func.func @fused_transformer_kernel(%arg0: memref<16x2xi32, #tpu.memory_space<vmem>>, %arg1: memref<1x16xf32, #tpu.memory_space<vmem>>, %arg2: memref<904x128xf32, #tpu.memory_space<vmem>>, %arg3: memref<8x128xf32, #tpu.memory_space<vmem>>) attributes {dimension_semantics = [], scalar_prefetch = 0 : i64, scratch_operands = 0 : i64, tpu.core_type = #tpu.core_type<tc>} {
    %c0 = arith.constant 0 : index
    %c0_0 = arith.constant 0 : index
    %0 = vector.load %arg0[%c0, %c0_0] : memref<16x2xi32, #tpu.memory_space<vmem>>, vector<16x2xi32>
    %1 = tpu.iota {dimensions = array<i32: 1>} : vector<16x18xi32>
    %2 = vector.extract_strided_slice %0 {offsets = [0, 0], sizes = [16, 1], strides = [1, 1]} : vector<16x2xi32> to vector<16x1xi32>
    %3 = vector.broadcast %2 : vector<16x1xi32> to vector<16x18xi32>
    %4 = arith.cmpi eq, %1, %3 : vector<16x18xi32>
    %5 = vector.extract_strided_slice %0 {offsets = [0, 1], sizes = [16, 1], strides = [1, 1]} : vector<16x2xi32> to vector<16x1xi32>
    %c16_i32 = arith.constant 16 : i32
    %6 = vector.broadcast %c16_i32 : i32 to vector<16x1xi32>
    %7 = arith.addi %5, %6 : vector<16x1xi32>
    %8 = vector.broadcast %7 : vector<16x1xi32> to vector<16x18xi32>
    %9 = arith.cmpi eq, %1, %8 : vector<16x18xi32>
    %10 = arith.ori %4, %9 : vector<16x18xi1>
    %11 = arith.extui %10 : vector<16x18xi1> to vector<16x18xi32>
    %12 = arith.sitofp %11 : vector<16x18xi32> to vector<16x18xf32>
    %c0_1 = arith.constant 0 : index
    %c0_2 = arith.constant 0 : index
    %13 = vector.load %arg2[%c0_1, %c0_2] : memref<904x128xf32, #tpu.memory_space<vmem>>, vector<18x32xf32>
    %cst = arith.constant dense<0.000000e+00> : vector<16x32xf32>
    %14 = tpu.matmul %12, %13, %cst {dimension_numbers = #tpu.dot_dimension_numbers<[1], [0], [0], [1], [0, 0, 1, 1], [], []>} : vector<16x18xf32>, vector<18x32xf32>, vector<16x32xf32> -> vector<16x32xf32>
    %c432 = arith.constant 432 : index
    %c0_3 = arith.constant 0 : index
    %15 = vector.load %arg2[%c432, %c0_3] : memref<904x128xf32, #tpu.memory_space<vmem>>, vector<1x32xf32>
    %c440 = arith.constant 440 : index
    %c0_4 = arith.constant 0 : index
    %16 = vector.load %arg2[%c440, %c0_4] : memref<904x128xf32, #tpu.memory_space<vmem>>, vector<1x32xf32>
    %cst_5 = arith.constant dense<0.000000e+00> : vector<16xf32>
    %17 = vector.multi_reduction <add>, %14, %cst_5 [1] : vector<16x32xf32> to vector<16xf32>
    %18 = vector.shape_cast %17 : vector<16xf32> to vector<16x1xf32>
    %cst_6 = arith.constant 3.200000e+01 : f32
    %19 = vector.broadcast %cst_6 : f32 to vector<16x1xf32>
    %20 = arith.divf %18, %19 : vector<16x1xf32>
    %21 = vector.broadcast %20 : vector<16x1xf32> to vector<16x32xf32>
    %22 = arith.subf %14, %21 : vector<16x32xf32>
    %23 = arith.mulf %22, %22 : vector<16x32xf32>
    %cst_7 = arith.constant dense<0.000000e+00> : vector<16xf32>
    %24 = vector.multi_reduction <add>, %23, %cst_7 [1] : vector<16x32xf32> to vector<16xf32>
    %25 = vector.shape_cast %24 : vector<16xf32> to vector<16x1xf32>
    %cst_8 = arith.constant 3.200000e+01 : f32
    %26 = vector.broadcast %cst_8 : f32 to vector<16x1xf32>
    %27 = arith.divf %25, %26 : vector<16x1xf32>
    %28 = vector.broadcast %20 : vector<16x1xf32> to vector<16x32xf32>
    %29 = arith.subf %14, %28 : vector<16x32xf32>
    %cst_9 = arith.constant 9.99999974E-6 : f32
    %30 = vector.broadcast %cst_9 : f32 to vector<16x1xf32>
    %31 = arith.addf %27, %30 : vector<16x1xf32>
    %32 = math.rsqrt %31 : vector<16x1xf32>
    %33 = vector.broadcast %32 : vector<16x1xf32> to vector<16x32xf32>
    %34 = arith.mulf %29, %33 : vector<16x32xf32>
    %35 = vector.broadcast %15 : vector<1x32xf32> to vector<16x32xf32>
    %36 = arith.mulf %34, %35 : vector<16x32xf32>
    %37 = vector.broadcast %16 : vector<1x32xf32> to vector<16x32xf32>
    %38 = arith.addf %36, %37 : vector<16x32xf32>
    %c416 = arith.constant 416 : index
    %c0_10 = arith.constant 0 : index
    %39 = vector.load %arg2[%c416, %c0_10] : memref<904x128xf32, #tpu.memory_space<vmem>>, vector<16x32xf32>
    %40 = arith.addf %38, %39 : vector<16x32xf32>
    %c24 = arith.constant 24 : index
    %c0_11 = arith.constant 0 : index
    %41 = vector.load %arg2[%c24, %c0_11] : memref<904x128xf32, #tpu.memory_space<vmem>>, vector<64x16xf32>
    %c88 = arith.constant 88 : index
    %c0_12 = arith.constant 0 : index
    %42 = vector.load %arg2[%c88, %c0_12] : memref<904x128xf32, #tpu.memory_space<vmem>>, vector<16x64xf32>
    %c104 = arith.constant 104 : index
    %c0_13 = arith.constant 0 : index
    %43 = vector.load %arg2[%c104, %c0_13] : memref<904x128xf32, #tpu.memory_space<vmem>>, vector<64x32xf32>
    %c0_14 = arith.constant 0 : index
    %c0_15 = arith.constant 0 : index
    %44 = vector.load %arg1[%c0_14, %c0_15] : memref<1x16xf32, #tpu.memory_space<vmem>>, vector<1x16xf32>
    %cst_16 = arith.constant dense<0.000000e+00> : vector<1x64xf32>
    %45 = tpu.matmul %44, %42, %cst_16 {dimension_numbers = #tpu.dot_dimension_numbers<[1], [0], [0], [1], [0, 0, 1, 1], [], []>} : vector<1x16xf32>, vector<16x64xf32>, vector<1x64xf32> -> vector<1x64xf32>
    %c168 = arith.constant 168 : index
    %c0_17 = arith.constant 0 : index
    %46 = vector.load %arg2[%c168, %c0_17] : memref<904x128xf32, #tpu.memory_space<vmem>>, vector<64x64xf32>
    %47 = vector.broadcast %45 : vector<1x64xf32> to vector<64x64xf32>
    %48 = arith.addf %46, %47 : vector<64x64xf32>
    %c456 = arith.constant 456 : index
    %c0_18 = arith.constant 0 : index
    %49 = vector.load %arg2[%c456, %c0_18] : memref<904x128xf32, #tpu.memory_space<vmem>>, vector<32x96xf32>
    %cst_19 = arith.constant dense<0.000000e+00> : vector<16x96xf32>
    %50 = tpu.matmul %40, %49, %cst_19 {dimension_numbers = #tpu.dot_dimension_numbers<[1], [0], [0], [1], [0, 0, 1, 1], [], []>} : vector<16x32xf32>, vector<32x96xf32>, vector<16x96xf32> -> vector<16x96xf32>
    %c488 = arith.constant 488 : index
    %c0_20 = arith.constant 0 : index
    %51 = vector.load %arg2[%c488, %c0_20] : memref<904x128xf32, #tpu.memory_space<vmem>>, vector<1x96xf32>
    %52 = vector.broadcast %51 : vector<1x96xf32> to vector<16x96xf32>
    %53 = arith.addf %50, %52 : vector<16x96xf32>
    %cst_21 = arith.constant dense<0.000000e+00> : vector<64x96xf32>
    %54 = tpu.matmul %41, %53, %cst_21 {dimension_numbers = #tpu.dot_dimension_numbers<[1], [0], [0], [1], [0, 0, 1, 1], [], []>} : vector<64x16xf32>, vector<16x96xf32>, vector<64x96xf32> -> vector<64x96xf32>
    %55 = vector.extract_strided_slice %54 {offsets = [0, 0], sizes = [64, 32], strides = [1, 1]} : vector<64x96xf32> to vector<64x32xf32>
    %56 = arith.mulf %55, %43 : vector<64x32xf32>
    %57 = vector.extract_strided_slice %54 {offsets = [0, 32], sizes = [64, 32], strides = [1, 1]} : vector<64x96xf32> to vector<64x32xf32>
    %58 = vector.extract_strided_slice %54 {offsets = [0, 64], sizes = [64, 32], strides = [1, 1]} : vector<64x96xf32> to vector<64x32xf32>
    %59 = arith.mulf %58, %43 : vector<64x32xf32>
    %cst_22 = arith.constant dense<0.000000e+00> : vector<64x64xf32>
    %60 = tpu.matmul %56, %57, %cst_22 {dimension_numbers = #tpu.dot_dimension_numbers<[1], [1], [0], [0], [0, 0, 1, 0], [], []>} : vector<64x32xf32>, vector<64x32xf32>, vector<64x64xf32> -> vector<64x64xf32>
    %61 = arith.addf %60, %48 : vector<64x64xf32>
    %cst_23 = arith.constant dense<0xFF800000> : vector<64xf32>
    %62 = vector.multi_reduction <maximumf>, %61, %cst_23 [1] : vector<64x64xf32> to vector<64xf32>
    %63 = vector.shape_cast %62 : vector<64xf32> to vector<64x1xf32>
    %64 = vector.broadcast %63 : vector<64x1xf32> to vector<64x64xf32>
    %65 = arith.subf %61, %64 : vector<64x64xf32>
    %66 = math.exp %65 : vector<64x64xf32>
    %cst_24 = arith.constant dense<0.000000e+00> : vector<64xf32>
    %67 = vector.multi_reduction <add>, %66, %cst_24 [1] : vector<64x64xf32> to vector<64xf32>
    %68 = vector.shape_cast %67 : vector<64xf32> to vector<64x1xf32>
    %69 = tpu.reciprocal %68 {approx = true} : vector<64x1xf32> -> vector<64x1xf32>
    %70 = vector.broadcast %69 : vector<64x1xf32> to vector<64x64xf32>
    %71 = arith.mulf %66, %70 : vector<64x64xf32>
    %cst_25 = arith.constant dense<0.000000e+00> : vector<64x32xf32>
    %72 = tpu.matmul %71, %59, %cst_25 {dimension_numbers = #tpu.dot_dimension_numbers<[1], [0], [0], [1], [0, 0, 1, 1], [], []>} : vector<64x64xf32>, vector<64x32xf32>, vector<64x32xf32> -> vector<64x32xf32>
    %cst_26 = arith.constant dense<0.000000e+00> : vector<16x32xf32>
    %73 = tpu.matmul %42, %72, %cst_26 {dimension_numbers = #tpu.dot_dimension_numbers<[1], [0], [0], [1], [0, 0, 1, 1], [], []>} : vector<16x64xf32>, vector<64x32xf32>, vector<16x32xf32> -> vector<16x32xf32>
    %c496 = arith.constant 496 : index
    %c0_27 = arith.constant 0 : index
    %74 = vector.load %arg2[%c496, %c0_27] : memref<904x128xf32, #tpu.memory_space<vmem>>, vector<32x32xf32>
    %cst_28 = arith.constant dense<0.000000e+00> : vector<16x32xf32>
    %75 = tpu.matmul %73, %74, %cst_28 {dimension_numbers = #tpu.dot_dimension_numbers<[1], [0], [0], [1], [0, 0, 1, 1], [], []>} : vector<16x32xf32>, vector<32x32xf32>, vector<16x32xf32> -> vector<16x32xf32>
    %c528 = arith.constant 528 : index
    %c0_29 = arith.constant 0 : index
    %76 = vector.load %arg2[%c528, %c0_29] : memref<904x128xf32, #tpu.memory_space<vmem>>, vector<1x32xf32>
    %77 = vector.broadcast %76 : vector<1x32xf32> to vector<16x32xf32>
    %78 = arith.addf %75, %77 : vector<16x32xf32>
    %79 = arith.addf %40, %78 : vector<16x32xf32>
    %c536 = arith.constant 536 : index
    %c0_30 = arith.constant 0 : index
    %80 = vector.load %arg2[%c536, %c0_30] : memref<904x128xf32, #tpu.memory_space<vmem>>, vector<1x32xf32>
    %c544 = arith.constant 544 : index
    %c0_31 = arith.constant 0 : index
    %81 = vector.load %arg2[%c544, %c0_31] : memref<904x128xf32, #tpu.memory_space<vmem>>, vector<1x32xf32>
    %cst_32 = arith.constant dense<0.000000e+00> : vector<16xf32>
    %82 = vector.multi_reduction <add>, %79, %cst_32 [1] : vector<16x32xf32> to vector<16xf32>
    %83 = vector.shape_cast %82 : vector<16xf32> to vector<16x1xf32>
    %cst_33 = arith.constant 3.200000e+01 : f32
    %84 = vector.broadcast %cst_33 : f32 to vector<16x1xf32>
    %85 = arith.divf %83, %84 : vector<16x1xf32>
    %86 = vector.broadcast %85 : vector<16x1xf32> to vector<16x32xf32>
    %87 = arith.subf %79, %86 : vector<16x32xf32>
    %88 = arith.mulf %87, %87 : vector<16x32xf32>
    %cst_34 = arith.constant dense<0.000000e+00> : vector<16xf32>
    %89 = vector.multi_reduction <add>, %88, %cst_34 [1] : vector<16x32xf32> to vector<16xf32>
    %90 = vector.shape_cast %89 : vector<16xf32> to vector<16x1xf32>
    %cst_35 = arith.constant 3.200000e+01 : f32
    %91 = vector.broadcast %cst_35 : f32 to vector<16x1xf32>
    %92 = arith.divf %90, %91 : vector<16x1xf32>
    %93 = vector.broadcast %85 : vector<16x1xf32> to vector<16x32xf32>
    %94 = arith.subf %79, %93 : vector<16x32xf32>
    %cst_36 = arith.constant 9.99999974E-6 : f32
    %95 = vector.broadcast %cst_36 : f32 to vector<16x1xf32>
    %96 = arith.addf %92, %95 : vector<16x1xf32>
    %97 = math.rsqrt %96 : vector<16x1xf32>
    %98 = vector.broadcast %97 : vector<16x1xf32> to vector<16x32xf32>
    %99 = arith.mulf %94, %98 : vector<16x32xf32>
    %100 = vector.broadcast %80 : vector<1x32xf32> to vector<16x32xf32>
    %101 = arith.mulf %99, %100 : vector<16x32xf32>
    %102 = vector.broadcast %81 : vector<1x32xf32> to vector<16x32xf32>
    %103 = arith.addf %101, %102 : vector<16x32xf32>
    %c552 = arith.constant 552 : index
    %c0_37 = arith.constant 0 : index
    %104 = vector.load %arg2[%c552, %c0_37] : memref<904x128xf32, #tpu.memory_space<vmem>>, vector<32x64xf32>
    %cst_38 = arith.constant dense<0.000000e+00> : vector<16x64xf32>
    %105 = tpu.matmul %103, %104, %cst_38 {dimension_numbers = #tpu.dot_dimension_numbers<[1], [0], [0], [1], [0, 0, 1, 1], [], []>} : vector<16x32xf32>, vector<32x64xf32>, vector<16x64xf32> -> vector<16x64xf32>
    %c584 = arith.constant 584 : index
    %c0_39 = arith.constant 0 : index
    %106 = vector.load %arg2[%c584, %c0_39] : memref<904x128xf32, #tpu.memory_space<vmem>>, vector<1x64xf32>
    %107 = vector.broadcast %106 : vector<1x64xf32> to vector<16x64xf32>
    %108 = arith.addf %105, %107 : vector<16x64xf32>
    %cst_40 = arith.constant 0.000000e+00 : f32
    %109 = vector.broadcast %cst_40 : f32 to vector<16x64xf32>
    %110 = arith.maximumf %108, %109 : vector<16x64xf32>
    %c592 = arith.constant 592 : index
    %c0_41 = arith.constant 0 : index
    %111 = vector.load %arg2[%c592, %c0_41] : memref<904x128xf32, #tpu.memory_space<vmem>>, vector<64x32xf32>
    %cst_42 = arith.constant dense<0.000000e+00> : vector<16x32xf32>
    %112 = tpu.matmul %110, %111, %cst_42 {dimension_numbers = #tpu.dot_dimension_numbers<[1], [0], [0], [1], [0, 0, 1, 1], [], []>} : vector<16x64xf32>, vector<64x32xf32>, vector<16x32xf32> -> vector<16x32xf32>
    %c656 = arith.constant 656 : index
    %c0_43 = arith.constant 0 : index
    %113 = vector.load %arg2[%c656, %c0_43] : memref<904x128xf32, #tpu.memory_space<vmem>>, vector<1x32xf32>
    %114 = vector.broadcast %113 : vector<1x32xf32> to vector<16x32xf32>
    %115 = arith.addf %112, %114 : vector<16x32xf32>
    %116 = arith.addf %103, %115 : vector<16x32xf32>
    %c664 = arith.constant 664 : index
    %c0_44 = arith.constant 0 : index
    %117 = vector.load %arg2[%c664, %c0_44] : memref<904x128xf32, #tpu.memory_space<vmem>>, vector<1x32xf32>
    %c672 = arith.constant 672 : index
    %c0_45 = arith.constant 0 : index
    %118 = vector.load %arg2[%c672, %c0_45] : memref<904x128xf32, #tpu.memory_space<vmem>>, vector<1x32xf32>
    %cst_46 = arith.constant dense<0.000000e+00> : vector<16xf32>
    %119 = vector.multi_reduction <add>, %116, %cst_46 [1] : vector<16x32xf32> to vector<16xf32>
    %120 = vector.shape_cast %119 : vector<16xf32> to vector<16x1xf32>
    %cst_47 = arith.constant 3.200000e+01 : f32
    %121 = vector.broadcast %cst_47 : f32 to vector<16x1xf32>
    %122 = arith.divf %120, %121 : vector<16x1xf32>
    %123 = vector.broadcast %122 : vector<16x1xf32> to vector<16x32xf32>
    %124 = arith.subf %116, %123 : vector<16x32xf32>
    %125 = arith.mulf %124, %124 : vector<16x32xf32>
    %cst_48 = arith.constant dense<0.000000e+00> : vector<16xf32>
    %126 = vector.multi_reduction <add>, %125, %cst_48 [1] : vector<16x32xf32> to vector<16xf32>
    %127 = vector.shape_cast %126 : vector<16xf32> to vector<16x1xf32>
    %cst_49 = arith.constant 3.200000e+01 : f32
    %128 = vector.broadcast %cst_49 : f32 to vector<16x1xf32>
    %129 = arith.divf %127, %128 : vector<16x1xf32>
    %130 = vector.broadcast %122 : vector<16x1xf32> to vector<16x32xf32>
    %131 = arith.subf %116, %130 : vector<16x32xf32>
    %cst_50 = arith.constant 9.99999974E-6 : f32
    %132 = vector.broadcast %cst_50 : f32 to vector<16x1xf32>
    %133 = arith.addf %129, %132 : vector<16x1xf32>
    %134 = math.rsqrt %133 : vector<16x1xf32>
    %135 = vector.broadcast %134 : vector<16x1xf32> to vector<16x32xf32>
    %136 = arith.mulf %131, %135 : vector<16x32xf32>
    %137 = vector.broadcast %117 : vector<1x32xf32> to vector<16x32xf32>
    %138 = arith.mulf %136, %137 : vector<16x32xf32>
    %139 = vector.broadcast %118 : vector<1x32xf32> to vector<16x32xf32>
    %140 = arith.addf %138, %139 : vector<16x32xf32>
    %c680 = arith.constant 680 : index
    %c0_51 = arith.constant 0 : index
    %141 = vector.load %arg2[%c680, %c0_51] : memref<904x128xf32, #tpu.memory_space<vmem>>, vector<32x96xf32>
    %cst_52 = arith.constant dense<0.000000e+00> : vector<16x96xf32>
    %142 = tpu.matmul %140, %141, %cst_52 {dimension_numbers = #tpu.dot_dimension_numbers<[1], [0], [0], [1], [0, 0, 1, 1], [], []>} : vector<16x32xf32>, vector<32x96xf32>, vector<16x96xf32> -> vector<16x96xf32>
    %c712 = arith.constant 712 : index
    %c0_53 = arith.constant 0 : index
    %143 = vector.load %arg2[%c712, %c0_53] : memref<904x128xf32, #tpu.memory_space<vmem>>, vector<1x96xf32>
    %144 = vector.broadcast %143 : vector<1x96xf32> to vector<16x96xf32>
    %145 = arith.addf %142, %144 : vector<16x96xf32>
    %cst_54 = arith.constant dense<0.000000e+00> : vector<64x96xf32>
    %146 = tpu.matmul %41, %145, %cst_54 {dimension_numbers = #tpu.dot_dimension_numbers<[1], [0], [0], [1], [0, 0, 1, 1], [], []>} : vector<64x16xf32>, vector<16x96xf32>, vector<64x96xf32> -> vector<64x96xf32>
    %147 = vector.extract_strided_slice %146 {offsets = [0, 0], sizes = [64, 32], strides = [1, 1]} : vector<64x96xf32> to vector<64x32xf32>
    %148 = arith.mulf %147, %43 : vector<64x32xf32>
    %149 = vector.extract_strided_slice %146 {offsets = [0, 32], sizes = [64, 32], strides = [1, 1]} : vector<64x96xf32> to vector<64x32xf32>
    %150 = vector.extract_strided_slice %146 {offsets = [0, 64], sizes = [64, 32], strides = [1, 1]} : vector<64x96xf32> to vector<64x32xf32>
    %151 = arith.mulf %150, %43 : vector<64x32xf32>
    %cst_55 = arith.constant dense<0.000000e+00> : vector<64x64xf32>
    %152 = tpu.matmul %148, %149, %cst_55 {dimension_numbers = #tpu.dot_dimension_numbers<[1], [1], [0], [0], [0, 0, 1, 0], [], []>} : vector<64x32xf32>, vector<64x32xf32>, vector<64x64xf32> -> vector<64x64xf32>
    %153 = arith.addf %152, %48 : vector<64x64xf32>
    %cst_56 = arith.constant dense<0xFF800000> : vector<64xf32>
    %154 = vector.multi_reduction <maximumf>, %153, %cst_56 [1] : vector<64x64xf32> to vector<64xf32>
    %155 = vector.shape_cast %154 : vector<64xf32> to vector<64x1xf32>
    %156 = vector.broadcast %155 : vector<64x1xf32> to vector<64x64xf32>
    %157 = arith.subf %153, %156 : vector<64x64xf32>
    %158 = math.exp %157 : vector<64x64xf32>
    %cst_57 = arith.constant dense<0.000000e+00> : vector<64xf32>
    %159 = vector.multi_reduction <add>, %158, %cst_57 [1] : vector<64x64xf32> to vector<64xf32>
    %160 = vector.shape_cast %159 : vector<64xf32> to vector<64x1xf32>
    %161 = tpu.reciprocal %160 {approx = true} : vector<64x1xf32> -> vector<64x1xf32>
    %162 = vector.broadcast %161 : vector<64x1xf32> to vector<64x64xf32>
    %163 = arith.mulf %158, %162 : vector<64x64xf32>
    %cst_58 = arith.constant dense<0.000000e+00> : vector<64x32xf32>
    %164 = tpu.matmul %163, %151, %cst_58 {dimension_numbers = #tpu.dot_dimension_numbers<[1], [0], [0], [1], [0, 0, 1, 1], [], []>} : vector<64x64xf32>, vector<64x32xf32>, vector<64x32xf32> -> vector<64x32xf32>
    %cst_59 = arith.constant dense<0.000000e+00> : vector<16x32xf32>
    %165 = tpu.matmul %42, %164, %cst_59 {dimension_numbers = #tpu.dot_dimension_numbers<[1], [0], [0], [1], [0, 0, 1, 1], [], []>} : vector<16x64xf32>, vector<64x32xf32>, vector<16x32xf32> -> vector<16x32xf32>
    %c720 = arith.constant 720 : index
    %c0_60 = arith.constant 0 : index
    %166 = vector.load %arg2[%c720, %c0_60] : memref<904x128xf32, #tpu.memory_space<vmem>>, vector<32x32xf32>
    %cst_61 = arith.constant dense<0.000000e+00> : vector<16x32xf32>
    %167 = tpu.matmul %165, %166, %cst_61 {dimension_numbers = #tpu.dot_dimension_numbers<[1], [0], [0], [1], [0, 0, 1, 1], [], []>} : vector<16x32xf32>, vector<32x32xf32>, vector<16x32xf32> -> vector<16x32xf32>
    %c752 = arith.constant 752 : index
    %c0_62 = arith.constant 0 : index
    %168 = vector.load %arg2[%c752, %c0_62] : memref<904x128xf32, #tpu.memory_space<vmem>>, vector<1x32xf32>
    %169 = vector.broadcast %168 : vector<1x32xf32> to vector<16x32xf32>
    %170 = arith.addf %167, %169 : vector<16x32xf32>
    %171 = arith.addf %140, %170 : vector<16x32xf32>
    %c760 = arith.constant 760 : index
    %c0_63 = arith.constant 0 : index
    %172 = vector.load %arg2[%c760, %c0_63] : memref<904x128xf32, #tpu.memory_space<vmem>>, vector<1x32xf32>
    %c768 = arith.constant 768 : index
    %c0_64 = arith.constant 0 : index
    %173 = vector.load %arg2[%c768, %c0_64] : memref<904x128xf32, #tpu.memory_space<vmem>>, vector<1x32xf32>
    %cst_65 = arith.constant dense<0.000000e+00> : vector<16xf32>
    %174 = vector.multi_reduction <add>, %171, %cst_65 [1] : vector<16x32xf32> to vector<16xf32>
    %175 = vector.shape_cast %174 : vector<16xf32> to vector<16x1xf32>
    %cst_66 = arith.constant 3.200000e+01 : f32
    %176 = vector.broadcast %cst_66 : f32 to vector<16x1xf32>
    %177 = arith.divf %175, %176 : vector<16x1xf32>
    %178 = vector.broadcast %177 : vector<16x1xf32> to vector<16x32xf32>
    %179 = arith.subf %171, %178 : vector<16x32xf32>
    %180 = arith.mulf %179, %179 : vector<16x32xf32>
    %cst_67 = arith.constant dense<0.000000e+00> : vector<16xf32>
    %181 = vector.multi_reduction <add>, %180, %cst_67 [1] : vector<16x32xf32> to vector<16xf32>
    %182 = vector.shape_cast %181 : vector<16xf32> to vector<16x1xf32>
    %cst_68 = arith.constant 3.200000e+01 : f32
    %183 = vector.broadcast %cst_68 : f32 to vector<16x1xf32>
    %184 = arith.divf %182, %183 : vector<16x1xf32>
    %185 = vector.broadcast %177 : vector<16x1xf32> to vector<16x32xf32>
    %186 = arith.subf %171, %185 : vector<16x32xf32>
    %cst_69 = arith.constant 9.99999974E-6 : f32
    %187 = vector.broadcast %cst_69 : f32 to vector<16x1xf32>
    %188 = arith.addf %184, %187 : vector<16x1xf32>
    %189 = math.rsqrt %188 : vector<16x1xf32>
    %190 = vector.broadcast %189 : vector<16x1xf32> to vector<16x32xf32>
    %191 = arith.mulf %186, %190 : vector<16x32xf32>
    %192 = vector.broadcast %172 : vector<1x32xf32> to vector<16x32xf32>
    %193 = arith.mulf %191, %192 : vector<16x32xf32>
    %194 = vector.broadcast %173 : vector<1x32xf32> to vector<16x32xf32>
    %195 = arith.addf %193, %194 : vector<16x32xf32>
    %c776 = arith.constant 776 : index
    %c0_70 = arith.constant 0 : index
    %196 = vector.load %arg2[%c776, %c0_70] : memref<904x128xf32, #tpu.memory_space<vmem>>, vector<32x64xf32>
    %cst_71 = arith.constant dense<0.000000e+00> : vector<16x64xf32>
    %197 = tpu.matmul %195, %196, %cst_71 {dimension_numbers = #tpu.dot_dimension_numbers<[1], [0], [0], [1], [0, 0, 1, 1], [], []>} : vector<16x32xf32>, vector<32x64xf32>, vector<16x64xf32> -> vector<16x64xf32>
    %c808 = arith.constant 808 : index
    %c0_72 = arith.constant 0 : index
    %198 = vector.load %arg2[%c808, %c0_72] : memref<904x128xf32, #tpu.memory_space<vmem>>, vector<1x64xf32>
    %199 = vector.broadcast %198 : vector<1x64xf32> to vector<16x64xf32>
    %200 = arith.addf %197, %199 : vector<16x64xf32>
    %cst_73 = arith.constant 0.000000e+00 : f32
    %201 = vector.broadcast %cst_73 : f32 to vector<16x64xf32>
    %202 = arith.maximumf %200, %201 : vector<16x64xf32>
    %c816 = arith.constant 816 : index
    %c0_74 = arith.constant 0 : index
    %203 = vector.load %arg2[%c816, %c0_74] : memref<904x128xf32, #tpu.memory_space<vmem>>, vector<64x32xf32>
    %cst_75 = arith.constant dense<0.000000e+00> : vector<16x32xf32>
    %204 = tpu.matmul %202, %203, %cst_75 {dimension_numbers = #tpu.dot_dimension_numbers<[1], [0], [0], [1], [0, 0, 1, 1], [], []>} : vector<16x64xf32>, vector<64x32xf32>, vector<16x32xf32> -> vector<16x32xf32>
    %c880 = arith.constant 880 : index
    %c0_76 = arith.constant 0 : index
    %205 = vector.load %arg2[%c880, %c0_76] : memref<904x128xf32, #tpu.memory_space<vmem>>, vector<1x32xf32>
    %206 = vector.broadcast %205 : vector<1x32xf32> to vector<16x32xf32>
    %207 = arith.addf %204, %206 : vector<16x32xf32>
    %208 = arith.addf %195, %207 : vector<16x32xf32>
    %c888 = arith.constant 888 : index
    %c0_77 = arith.constant 0 : index
    %209 = vector.load %arg2[%c888, %c0_77] : memref<904x128xf32, #tpu.memory_space<vmem>>, vector<1x32xf32>
    %c896 = arith.constant 896 : index
    %c0_78 = arith.constant 0 : index
    %210 = vector.load %arg2[%c896, %c0_78] : memref<904x128xf32, #tpu.memory_space<vmem>>, vector<1x32xf32>
    %cst_79 = arith.constant dense<0.000000e+00> : vector<16xf32>
    %211 = vector.multi_reduction <add>, %208, %cst_79 [1] : vector<16x32xf32> to vector<16xf32>
    %212 = vector.shape_cast %211 : vector<16xf32> to vector<16x1xf32>
    %cst_80 = arith.constant 3.200000e+01 : f32
    %213 = vector.broadcast %cst_80 : f32 to vector<16x1xf32>
    %214 = arith.divf %212, %213 : vector<16x1xf32>
    %215 = vector.broadcast %214 : vector<16x1xf32> to vector<16x32xf32>
    %216 = arith.subf %208, %215 : vector<16x32xf32>
    %217 = arith.mulf %216, %216 : vector<16x32xf32>
    %cst_81 = arith.constant dense<0.000000e+00> : vector<16xf32>
    %218 = vector.multi_reduction <add>, %217, %cst_81 [1] : vector<16x32xf32> to vector<16xf32>
    %219 = vector.shape_cast %218 : vector<16xf32> to vector<16x1xf32>
    %cst_82 = arith.constant 3.200000e+01 : f32
    %220 = vector.broadcast %cst_82 : f32 to vector<16x1xf32>
    %221 = arith.divf %219, %220 : vector<16x1xf32>
    %222 = vector.broadcast %214 : vector<16x1xf32> to vector<16x32xf32>
    %223 = arith.subf %208, %222 : vector<16x32xf32>
    %cst_83 = arith.constant 9.99999974E-6 : f32
    %224 = vector.broadcast %cst_83 : f32 to vector<16x1xf32>
    %225 = arith.addf %221, %224 : vector<16x1xf32>
    %226 = math.rsqrt %225 : vector<16x1xf32>
    %227 = vector.broadcast %226 : vector<16x1xf32> to vector<16x32xf32>
    %228 = arith.mulf %223, %227 : vector<16x32xf32>
    %229 = vector.broadcast %209 : vector<1x32xf32> to vector<16x32xf32>
    %230 = arith.mulf %228, %229 : vector<16x32xf32>
    %231 = vector.broadcast %210 : vector<1x32xf32> to vector<16x32xf32>
    %232 = arith.addf %230, %231 : vector<16x32xf32>
    %c232 = arith.constant 232 : index
    %c0_84 = arith.constant 0 : index
    %233 = vector.load %arg2[%c232, %c0_84] : memref<904x128xf32, #tpu.memory_space<vmem>>, vector<32x128xf32>
    %cst_85 = arith.constant dense<0.000000e+00> : vector<16x128xf32>
    %234 = tpu.matmul %232, %233, %cst_85 {dimension_numbers = #tpu.dot_dimension_numbers<[1], [0], [0], [1], [0, 0, 1, 1], [], []>} : vector<16x32xf32>, vector<32x128xf32>, vector<16x128xf32> -> vector<16x128xf32>
    %c400 = arith.constant 400 : index
    %c0_86 = arith.constant 0 : index
    %235 = vector.load %arg2[%c400, %c0_86] : memref<904x128xf32, #tpu.memory_space<vmem>>, vector<16x128xf32>
    %236 = arith.mulf %234, %235 : vector<16x128xf32>
    %c264 = arith.constant 264 : index
    %c0_87 = arith.constant 0 : index
    %237 = vector.load %arg2[%c264, %c0_87] : memref<904x128xf32, #tpu.memory_space<vmem>>, vector<128x128xf32>
    %cst_88 = arith.constant dense<0.000000e+00> : vector<16x128xf32>
    %238 = tpu.matmul %236, %237, %cst_88 {dimension_numbers = #tpu.dot_dimension_numbers<[1], [0], [0], [1], [0, 0, 1, 1], [], []>} : vector<16x128xf32>, vector<128x128xf32>, vector<16x128xf32> -> vector<16x128xf32>
    %c392 = arith.constant 392 : index
    %c0_89 = arith.constant 0 : index
    %239 = vector.load %arg2[%c392, %c0_89] : memref<904x128xf32, #tpu.memory_space<vmem>>, vector<8x16xf32>
    %cst_90 = arith.constant dense<0.000000e+00> : vector<8x128xf32>
    %240 = tpu.matmul %239, %238, %cst_90 {dimension_numbers = #tpu.dot_dimension_numbers<[1], [0], [0], [1], [0, 0, 1, 1], [], []>} : vector<8x16xf32>, vector<16x128xf32>, vector<8x128xf32> -> vector<8x128xf32>
    %c448 = arith.constant 448 : index
    %c0_91 = arith.constant 0 : index
    %241 = vector.load %arg2[%c448, %c0_91] : memref<904x128xf32, #tpu.memory_space<vmem>>, vector<1x128xf32>
    %242 = vector.broadcast %241 : vector<1x128xf32> to vector<8x128xf32>
    %243 = arith.addf %240, %242 : vector<8x128xf32>
    %244 = arith.mulf %243, %243 : vector<8x128xf32>
    %cst_92 = arith.constant dense<0.000000e+00> : vector<8xf32>
    %245 = vector.multi_reduction <add>, %244, %cst_92 [1] : vector<8x128xf32> to vector<8xf32>
    %246 = vector.shape_cast %245 : vector<8xf32> to vector<8x1xf32>
    %cst_93 = arith.constant 1.000000e-24 : f32
    %247 = vector.broadcast %cst_93 : f32 to vector<8x1xf32>
    %248 = arith.maximumf %246, %247 : vector<8x1xf32>
    %249 = math.rsqrt %248 : vector<8x1xf32>
    %250 = vector.broadcast %249 : vector<8x1xf32> to vector<8x128xf32>
    %251 = arith.mulf %243, %250 : vector<8x128xf32>
    %c0_94 = arith.constant 0 : index
    %c0_95 = arith.constant 0 : index
    %252 = vector.load %arg3[%c0_94, %c0_95] : memref<8x128xf32, #tpu.memory_space<vmem>>, vector<8x128xf32>
    tpu.vector_store %arg3[%c0_94, %c0_95], %251 {strides = array<i32>} : memref<8x128xf32, #tpu.memory_space<vmem>>, vector<8x128xf32>,
    return
  }
}

</mosaic_0001>

<bundles_post_ra>
// kernel: transformer_forward.1
= control target key start
LH: loop header
LB: loop body
LE: loop exit
PB: predicated region body
PF: predicated region fallthrough
CT: control target
= control target key end

     0   :  { %8 = vsyncpa [#allocation3], 0  ;;  %s3551_s12 = smov [#allocation2]   ;;  %s4078_s0 = inlined_call_operand.vmem [shape: s32[16,2], index: 0, kind: input, shape index: {}]   ;;  %s4079_s1 = inlined_call_operand.vmem [shape: f32[1,16], index: 1, kind: input, shape index: {}]   ;;  %s4080_s2 = inlined_call_operand.hbm [shape: f32[904,128], index: 2, kind: input, shape index: {}]   ;;  %s4081_s3 = inlined_call_operand.vmem [shape: f32[8,128], index: 3, kind: output, shape index: {}]  }
   0x1   :  { %s18_s13 = sshll.u32 %s3551_s12, 4  ;;  %s19_s13 = int_to_ptr.vmem [resolvable:$true] %s18_s13 }
   0x2   :  { %s3537_s14 = scalar_lea.vmem %s19_s13, 14464  ;;  %p3542_p1 = scmp.lt.s32.totalorder %s19_s13, %s19_s13 }
   0x3   :  { %p3538_p0 = scmp.ne.s32.totalorder %s19_s13, %s3537_s14  ;;  %p3543_p2 = scmp.lt.s32.totalorder %s3537_s14, %s3537_s14 }
   0x5   :  { %p3544_p3 = por %p3543_p2, %p3542_p1 }
   0x7   :  { %p3545_p4 = pnand %p3544_p3, %p3538_p0 }
   0x9   :  { %3548 = shalt.err (!%p3545_p4)
}
   0xa   :  { %s3552_s15 = smov 128   ;;  %s3553_s16 = smov 8  }
   0xb   :  { %24 = dma.hbm_to_vmem [thread:$0]  %s4080_s2, 14464, %s19_s13, [#allocation3], %s3552_s15, %s3552_s15, %s3553_s16  }
   0xc   :  { %3549 = dma.done.wait [#allocation3], 14464  }
   0xd   :  { %3550 = vsyncadd [#allocation3], 4294952832  ;;  %v3554_v0 = vmov 0   ;;  %v3555_v1 = vmov 0.0   ;;  %vm66_vm0 = vcmask 1041408   ;;  %v29_v2 = vld [vmem:[%s4078_s0 + $0x8] sm:$0xff]  ;;  %v30_v10 = vlaneseq }
   0xe   :  { %3439 = vset.pattern.permute.xlu1 %v3554_v0  ;;  %3437 = vset.pattern.permute.xlu0 %v3554_v0  ;;  %v28_v3 = vld [vmem:[%s4078_s0] sm:$0xff]  ;;  %v58_v4 = vld [vmem:[#allocation2 + $0x10] sm:$0x3]  ;;  %v57_v5 = vld [vmem:[#allocation2 + $0x8] sm:$0xff]  ;;  %v41_v6 = vadd.s32 16, %v29_v2  ;;  %v3556_v8 = vmov 1  }
   0xf   :  { %3082 = vmatprep.subr.mxu1 %v3555_v1  ;;  %36 = vperm.xlu1 %3439, %v29_v2   ;;  %v40_v7 = vadd.s32 16, %v28_v3  ;;  %v56_v9 = vld [vmem:[#allocation2] sm:$0xff]  ;;  %v31_v13 = vand.u32 127, %v30_v10  ;;  %vm59_vm6 = vcmask 146432   ;;  %vm147_vm8 = vcmask 261120   ;;  %v3599_v33 = vld [vmem:[#allocation2 + $0x58] sm:$0xff] }
  0x10   :  { %33 = vperm.xlu0 %3437, %v28_v3   ;;  %3073 = vmatprep.subr.msk.mxu0 %vm66_vm0, %v58_v4  ;;  %v3597_v32 = vld [vmem:[#allocation2 + $0x60] sm:$0xff]  ;;  %vm3557_vm9 = vmmov 0   ;;  %vm210_vm10 = vcmask 130048   ;;  %v306_v36 = vld [vmem:[#allocation2 + $0x1d8] sm:$0xff]  ;;  %v305_v37 = vld [vmem:[#allocation2 + $0x1d0] sm:$0xff]  ;;  %s3559_s23 = smov 64  }
  0x11   :  { %3074 = vmatpush3.msk.msra.mxu0 %vm66_vm0, %v58_v4  ;;  %3083 = vmatpush3.msra.mxu1 %v3597_v32  ;;  %v209_v34 = vld [vmem:[%s4079_s1] sm:$0x1]  ;;  %v304_v38 = vld [vmem:[#allocation2 + $0x1c8] sm:$0xff]  ;;  %v2771_v46 = vld [vmem:[#allocation2 + $0x1b0] ss:$0 sm:$0xff]  ;;  %s3558_s1 = smov 96  }
  0x12   :  { %3075 = vmatprep.subr.mxu0 %v57_v5  ;;  %3086 = vmatprep.mubr.msk.f32.mxu1 %vm3557_vm9, %v3555_v1  ;;  %v307_v35 = vld [vmem:[#allocation2 + $0x1e0] sm:$0xff]  ;;  %v2772_v49 = vld [vmem:[#allocation2 + $0x1b8] ss:$0 sm:$0xff]  ;;  %v188_v56 = vld [vmem:[#allocation2 + $0x1a8] sm:$0xff]  ;;  %vm740_vm11 = vcmask 523264  }
  0x13   :  { %3440 = vset.pattern.permute.xlu1 %v3556_v8  ;;  %3076 = vmatpush3.msra.mxu0 %v57_v5  ;;  %v187_v54 = vld [vmem:[#allocation2 + $0x1a0] sm:$0xff]  ;;  %v3620_v61 = vld [vmem:[#allocation2 + $0x18] sm:$0xff]  ;;  %v2774_v62 = vld [vmem:[#allocation2 + $0x1e8] ss:$0 sm:$0xff] }
  0x14   :  { %3438 = vset.pattern.permute.xlu0 %v3556_v8  ;;  %46 = vperm.xlu1 %3440, %v41_v6   ;;  %v3624_v4 = vld [vmem:[#allocation2 + $0x20] sm:$0xff]  ;;  %v3626_v5 = vld [vmem:[#allocation2 + $0x28] sm:$0xff]  ;;  %v3632_v6 = vld [vmem:[#allocation2 + $0x30] sm:$0xff] }
  0x15   :  { %43 = vperm.xlu0 %3438, %v40_v7   ;;  %3077 = vmatprep.subr.mxu0 %v56_v9  ;;  %v3634_v7 = vld [vmem:[#allocation2 + $0x38] sm:$0xff]  ;;  %v3640_v8 = vld [vmem:[#allocation2 + $0x40] sm:$0xff] }
  0x16   :  { %3078 = vmatpush3.msra.mxu0 %v56_v9  ;;  %3084 = vmatprep.subr.mxu1 %v3555_v1  ;;  %v3642_v9 = vld [vmem:[#allocation2 + $0x48] sm:$0xff] }
  0x17   :  { %3085 = vmatpush3.msra.mxu1 %v3599_v33 }
  0x18   :  { %3087 = vmatmul.mubr.msk.f32.vlgmr.msra.gmra.mxu1 %vm210_vm10, %v209_v34  ;;  %3089 = vmatprep.subr.mxu1 %v307_v35 }
  0x19   :  { %3090 = vmatpush3.msra.mxu1 %v307_v35 }
  0x1a   :  { %3091 = vmatprep.subr.mxu1 %v306_v36 }
  0x1b   :  { %3092 = vmatpush3.msra.mxu1 %v306_v36 }
  0x1c   :  { %3093 = vmatprep.subr.mxu1 %v305_v37 }
  0x1d   :  { %3094 = vmatpush3.msra.mxu1 %v305_v37 }
  0x1e   :  { %3095 = vmatprep.subr.mxu1 %v304_v38 }
  0x1f   :  { %3096 = vmatpush3.msra.mxu1 %v304_v38 }
  0x8a   :  { %v37_v12 = vpop.permute.xlu1 %36 }
  0x8b   :  { %v34_v11 = vpop.permute.xlu0 %33  ;;  %vm39_vm1 = vcmp.eq.s32.totalorder %v31_v13, %v37_v12 }
  0x8c   :  { %vm38_vm4 = vcmp.eq.s32.totalorder %v31_v13, %v34_v11  ;;  %v3648_v11 = vld [vmem:[#allocation2 + $0x50] sm:$0xff] }
  0x8f   :  { %v47_v14 = vpop.permute.xlu1 %46 }
  0x90   :  { %v44_v15 = vpop.permute.xlu0 %43  ;;  %vm49_vm2 = vcmp.eq.s32.totalorder %v31_v13, %v47_v14 }
  0x91   :  { %vm48_vm3 = vcmp.eq.s32.totalorder %v31_v13, %v44_v15  ;;  %vm51_vm5 = vmor %vm39_vm1, %vm49_vm2  ;;  %v3654_v13 = vld [vmem:[#allocation2 + $0x68] sm:$0xff] }
  0x92   :  { %v2767_v16 = vsel %vm51_vm5, 1.0, %v3555_v1  ;;  %vm50_vm7 = vmor %vm38_vm4, %vm48_vm3 }
  0x93   :  { %v2766_v17 = vsel %vm50_vm7, 1.0, %v3555_v1 }
  0x94   :  { %3079 = vmatprep.mubr.msk.f32.mxu0 %vm59_vm6, %v2766_v17 }
  0x95   :  { %3080 = vmatmul.mubr.msk.f32.vlgmr.msra.gmra.mxu0 %vm59_vm6, %v2767_v16 }
  0xd8   :  { %v3618_v59 = vpop.f32.mrf.mxu1 }
  0xda   :  { %v3088_v60 = vpop.f32.mrf.mxu1 }
  0xdb   :  { %v286_v60 = vld [vmem:[#allocation2 + $0xb8] sm:$0xff] }
 0x155   :  { %v3081_v18 = vpop.f32.mrf.mxu0 }
 0x156   :  { %v151_v19 = vsel %vm147_vm8, %v3081_v18, 0.0 }
 0x157   :  { %152 = vadd.xlane.f32.xlu0 %v151_v19  ;;  %v136_v20 = vpop.f32.mrf.mxu0 }
 0x158   :  { %v148_v21 = vsel %vm147_vm8, %v136_v20, 0.0 }
 0x159   :  { %149 = vadd.xlane.f32.xlu1 %v148_v21 }
 0x1e0   :  { %v153_v22 = vpop.xlane.xlu0 %152 }
 0x1e1   :  { %v156_v23 = vmul.f32 0.03125, %v153_v22  ;;  %v3689_v22 = vld [vmem:[#allocation2 + $0xa0] sm:$0xff] }
 0x1e2   :  { %v150_v24 = vpop.xlane.xlu1 %149 }
 0x1e3   :  { %v158_v25 = vsub.f32 %v3081_v18, %v156_v23  ;;  %v155_v26 = vmul.f32 0.03125, %v150_v24  ;;  %v3693_v23 = vld [vmem:[#allocation2 + $0x98] sm:$0xff]  ;;  %v3697_v24 = vld [vmem:[#allocation2 + $0x88] sm:$0xff] }
 0x1e5   :  { %v157_v27 = vsub.f32 %v136_v20, %v155_v26  ;;  %v160_v28 = vmul.f32 %v158_v25, %v158_v25  ;;  %v3705_v26 = vld [vmem:[#allocation2 + $0x78] sm:$0xff] }
 0x1e7   :  { %v164_v29 = vsel %vm147_vm8, %v160_v28, 0.0  ;;  %v159_v30 = vmul.f32 %v157_v27, %v157_v27  ;;  %v3715_v28 = vld [vmem:[#allocation2 + $0x70] sm:$0xff] }
 0x1e8   :  { %165 = vadd.xlane.f32.xlu1 %v164_v29 }
 0x1e9   :  { %v161_v31 = vsel %vm147_vm8, %v159_v30, 0.0 }
 0x1ea   :  { %162 = vadd.xlane.f32.xlu0 %v161_v31 }
 0x271   :  { %v166_v39 = vpop.xlane.xlu1 %165 }
 0x272   :  { %v168_v40 = vmul.f32 0.03125, %v166_v39 }
 0x273   :  { %v163_v41 = vpop.xlane.xlu0 %162 }
 0x274   :  { %v170_v42 = vadd.f32 1e-05, %v168_v40  ;;  %v167_v43 = vmul.f32 0.03125, %v163_v41 }
 0x276   :  { %3441 = vrsqrt.f32 %v170_v42  ;;  %v169_v44 = vadd.f32 1e-05, %v167_v43 }
 0x278   :  { %3443 = vrsqrt.f32 %v169_v44 }
 0x283   :  { %v3442_v45 = vpop.eup %3441 }
 0x284   :  { %v174_v47 = vmul.f32 %v3442_v45, %v158_v25  ;;  %v3701_v25 = vld [vmem:[#allocation2 + $0x90] sm:$0xff] }
 0x285   :  { %v3444_v48 = vpop.eup %3443 }
 0x286   :  { %v173_v50 = vmul.f32 %v3444_v48, %v157_v27  ;;  %v180_v51 = vmul.f32 %v2771_v46, %v174_v47  ;;  %v3709_v27 = vld [vmem:[#allocation2 + $0x80] sm:$0xff] }
 0x288   :  { %v179_v52 = vmul.f32 %v2771_v46, %v173_v50  ;;  %v186_v53 = vadd.f32 %v2772_v49, %v180_v51  ;;  %v293_v46 = vshrl.u32 %v30_v10, 7  ;;  %v284_v50 = vld [vmem:[#allocation2 + $0xa8] sm:$0xff] }
 0x28a   :  { %v185_v55 = vadd.f32 %v2772_v49, %v179_v52  ;;  %v3612_v58 = vadd.f32 %v188_v56, %v186_v53  ;;  %v294_v47 = vsub.s32 0, %v293_v46  ;;  %v285_v49 = vld [vmem:[#allocation2 + $0xb0] sm:$0xff]  ;;  %v287_v53 = vld [vmem:[#allocation2 + $0xc0] sm:$0xff] }
 0x28c   :  { %v3610_v57 = vadd.f32 %v187_v54, %v185_v55  ;;  %v295_v48 = vrot.slane %v3618_v59, %v294_v47 }
 0x28e   :  { %3097 = vmatprep.mubr.msk.f32.mxu1 %vm147_vm8, %v3610_v57  ;;  %v3760_v51 = vadd.f32 %v295_v48, %v285_v49  ;;  %v3765_v55 = vadd.f32 %v295_v48, %v284_v50  ;;  %v3772_v59 = vadd.f32 %v295_v48, %v287_v53 }
 0x28f   :  { %3098 = vmatmul.mubr.msk.f32.vlgmr.msra.gmra.mxu1 %vm147_vm8, %v3612_v58 }
 0x290   :  { %3104 = vmatprep.mubr.msk.f32.mxu1 %vm210_vm10, %v3620_v61 }
 0x34f   :  { %v3099_v63 = vpop.f32.mrf.mxu1 }
 0x350   :  { %v391_v0 = vadd.f32 %v3099_v63, %v2774_v62  ;;  %v289_v63 = vld [vmem:[#allocation2 + $0xd0] sm:$0xff] }
 0x351   :  { %v385_v2 = vpop.f32.mrf.mxu1 }
 0x352   :  { %v386_v3 = vadd.f32 %v2774_v62, %v385_v2  ;;  %3100 = vmatprep.subr.mxu1 %v391_v0  ;;  %v3777_v2 = vadd.f32 %v295_v48, %v286_v60 }
 0x353   :  { %3101 = vmatpush3.msra.mxu1 %v391_v0 }
 0x354   :  { %3102 = vmatprep.subr.mxu1 %v386_v3 }
 0x355   :  { %3103 = vmatpush3.msra.mxu1 %v386_v3 }
 0x356   :  { %3105 = vmatmul.mubr.msk.f32.vlgmr.msra.gmra.mxu1 %vm210_vm10, %v3624_v4 }
 0x357   :  { %3107 = vmatprep.mubr.msk.f32.mxu1 %vm210_vm10, %v3626_v5 }
 0x35a   :  { %3108 = vmatmul.mubr.msk.f32.gmra.mxu1 %vm210_vm10, %v3632_v6 }
 0x35b   :  { %3110 = vmatprep.mubr.msk.f32.mxu1 %vm210_vm10, %v3634_v7 }
 0x35e   :  { %3111 = vmatmul.mubr.msk.f32.gmra.mxu1 %vm210_vm10, %v3640_v8 }
 0x35f   :  { %3113 = vmatprep.mubr.msk.f32.mxu1 %vm210_vm10, %v3642_v9 }
 0x362   :  { %3114 = vmatmul.mubr.msk.f32.gmra.mxu1 %vm210_vm10, %v3648_v11 }
 0x363   :  { %3188 = vmatprep.mubr.msk.f32.mxu1 %vm740_vm11, %v3599_v33 }
 0x416   :  { %v3652_v12 = vpop.f32.mrf.mxu1 }
 0x417   :  { %v524_v39 = vmul.f32 %v3652_v12, %v3715_v28 }
 0x418   :  { %v3656_v14 = vpop.f32.mrf.mxu1 }
 0x419   :  { %v523_v15 = vmul.f32 %v3656_v14, %v3654_v13 }
 0x41a   :  { %v3660_v16 = vpop.f32.mrf.mxu1 }
 0x41b   :  { %3132 = vmatprep.mubr.msk.f32.mxu0 %vm147_vm8, %v523_v15  ;;  %v526_v41 = vmul.f32 %v3660_v16, %v3709_v27 }
 0x41c   :  { %v3663_v17 = vpop.f32.mrf.mxu1 }
 0x41d   :  { %v525_v40 = vmul.f32 %v3663_v17, %v3705_v26 }
 0x41e   :  { %v3665_v18 = vpop.f32.mrf.mxu1 }
 0x41f   :  { %v528_v43 = vmul.f32 %v3665_v18, %v3701_v25 }
 0x420   :  { %v3667_v19 = vpop.f32.mrf.mxu1 }
 0x421   :  { %v527_v42 = vmul.f32 %v3667_v19, %v3697_v24 }
 0x422   :  { %v3669_v20 = vpop.f32.mrf.mxu1 }
 0x423   :  { %593 = vrot.lane.b32.xlu0 %v3669_v20, %s3558_s1  ;;  %v530_v45 = vmul.f32 %v3669_v20, %v3689_v22 }
 0x424   :  { %v3673_v21 = vpop.f32.mrf.mxu1 }
 0x425   :  { %591 = vrot.lane.b32.xlu1 %v3673_v21, %s3558_s1  ;;  %v529_v44 = vmul.f32 %v3673_v21, %v3693_v23 }
 0x427   :  { %587 = vrot.lane.b32.xlu0 %v3667_v19, %s3558_s1 }
 0x429   :  { %589 = vrot.lane.b32.xlu1 %v3665_v18, %s3558_s1 }
 0x42b   :  { %583 = vrot.lane.b32.xlu0 %v3663_v17, %s3558_s1 }
 0x42d   :  { %585 = vrot.lane.b32.xlu1 %v3660_v16, %s3558_s1 }
 0x42f   :  { %579 = vrot.lane.b32.xlu0 %v3656_v14, %s3558_s1 }
 0x431   :  { %581 = vrot.lane.b32.xlu1 %v3652_v12, %s3558_s1 }
 0x433   :  { %553 = vrot.lane.b32.xlu0 %v3689_v22, %s3559_s23 }
 0x435   :  { %551 = vrot.lane.b32.xlu1 %v3693_v23, %s3559_s23 }
 0x437   :  { %547 = vrot.lane.b32.xlu0 %v3697_v24, %s3559_s23 }
 0x439   :  { %549 = vrot.lane.b32.xlu1 %v3701_v25, %s3559_s23 }
 0x43b   :  { %543 = vrot.lane.b32.xlu0 %v3705_v26, %s3559_s23 }
 0x43d   :  { %545 = vrot.lane.b32.xlu1 %v3709_v27, %s3559_s23 }
 0x43f   :  { %539 = vrot.lane.b32.xlu0 %v3654_v13, %s3559_s23 }
 0x441   :  { %541 = vrot.lane.b32.xlu1 %v3715_v28, %s3559_s23 }
 0x495   :  { %v594_v29 = vpop.permute.xlu0 %593 }
 0x496   :  { %3116 = vmatprep.subr.msk.mxu0 %vm147_vm8, %v594_v29 }
 0x497   :  { %3117 = vmatpush3.xpose.msk.msra.mxu0 %vm147_vm8, %v594_v29  ;;  %v592_v30 = vpop.permute.xlu1 %591  ;;  %v288_v29 = vld [vmem:[#allocation2 + $0xc8] sm:$0xff] }
 0x498   :  { %3118 = vmatprep.subr.msk.mxu0 %vm147_vm8, %v592_v30 }
 0x499   :  { %v588_v34 = vpop.permute.xlu0 %587 }
 0x49b   :  { %3119 = vmatpush3.xpose.msk.msra.mxu0 %vm147_vm8, %v592_v30  ;;  %v590_v31 = vpop.permute.xlu1 %589 }
 0x49c   :  { %3120 = vmatprep.subr.msk.mxu0 %vm147_vm8, %v590_v31 }
 0x49d   :  { %v584_v36 = vpop.permute.xlu0 %583 }
 0x49f   :  { %3121 = vmatpush3.xpose.msk.msra.mxu0 %vm147_vm8, %v590_v31  ;;  %v586_v35 = vpop.permute.xlu1 %585  ;;  %v3782_v31 = vadd.f32 %v295_v48, %v289_v63 }
 0x4a0   :  { %3122 = vmatprep.subr.msk.mxu0 %vm147_vm8, %v588_v34 }
 0x4a1   :  { %v580_v38 = vpop.permute.xlu0 %579 }
 0x4a3   :  { %3123 = vmatpush3.xpose.msk.msra.mxu0 %vm147_vm8, %v588_v34  ;;  %v582_v37 = vpop.permute.xlu1 %581 }
 0x4a4   :  { %3124 = vmatprep.subr.msk.mxu0 %vm147_vm8, %v586_v35 }
 0x4a7   :  { %3125 = vmatpush3.xpose.msk.msra.mxu0 %vm147_vm8, %v586_v35  ;;  %v291_v35 = vld [vmem:[#allocation2 + $0xe0] sm:$0xff]  ;;  %v3804_v60 = vpop.permute.xlu1 %551 }
 0x4a8   :  { %3126 = vmatprep.subr.msk.mxu0 %vm147_vm8, %v584_v36 }
 0x4ab   :  { %3127 = vmatpush3.xpose.msk.msra.mxu0 %vm147_vm8, %v584_v36 }
 0x4ac   :  { %3128 = vmatprep.subr.msk.mxu0 %vm147_vm8, %v582_v37 }
 0x4af   :  { %3129 = vmatpush3.xpose.msk.msra.mxu0 %vm147_vm8, %v582_v37  ;;  %v3787_v37 = vadd.f32 %v295_v48, %v288_v29 }
 0x4b0   :  { %3130 = vmatprep.subr.msk.mxu0 %vm147_vm8, %v580_v38 }
 0x4b3   :  { %3131 = vmatpush3.xpose.msk.msra.mxu0 %vm147_vm8, %v580_v38 }
 0x4b6   :  { %3133 = vmatmul.mubr.msk.f32.vlgmr.msra.gmra.mxu0 %vm147_vm8, %v524_v39 }
 0x4b7   :  { %3135 = vmatprep.mubr.msk.f32.mxu0 %vm147_vm8, %v525_v40 }
 0x4ba   :  { %3136 = vmatmul.mubr.msk.f32.gmra.mxu0 %vm147_vm8, %v526_v41  ;;  %v290_v41 = vld [vmem:[#allocation2 + $0xd8] sm:$0xff] }
 0x4bb   :  { %3138 = vmatprep.mubr.msk.f32.mxu0 %vm147_vm8, %v527_v42  ;;  %v3799_v49 = vadd.f32 %v295_v48, %v290_v41 }
 0x4be   :  { %3139 = vmatmul.mubr.msk.f32.gmra.mxu0 %vm147_vm8, %v528_v43  ;;  %v3793_v43 = vadd.f32 %v295_v48, %v291_v35  ;;  %v569_v48 = vmul.f32 %v3804_v60, %v3673_v21 }
 0x4bf   :  { %3141 = vmatprep.mubr.msk.f32.mxu0 %vm147_vm8, %v529_v44 }
 0x4c2   :  { %3142 = vmatmul.mubr.msk.f32.gmra.mxu0 %vm147_vm8, %v530_v45 }
 0x576   :  { %v3134_v52 = vpop.f32.mrf.mxu0 }
 0x577   :  { %v3763_v54 = vadd.f32 %v3134_v52, %v3760_v51 }
 0x578   :  { %v701_v56 = vpop.f32.mrf.mxu0 }
 0x579   :  { %v3768_v33 = vadd.f32 %v701_v56, %v3765_v55  ;;  %v744_v10 = vsel %vm740_vm11, %v3763_v54, -inf }
 0x57a   :  { %745 = vmax.xlane.f32.xlu0 %v744_v10  ;;  %v3137_v62 = vpop.f32.mrf.mxu0  ;;  %v3806_v10 = vpop.permute.xlu0 %553 }
 0x57b   :  { %v3775_v0 = vadd.f32 %v3137_v62, %v3772_v59  ;;  %v741_v3 = vsel %vm740_vm11, %v3768_v33, -inf  ;;  %v3808_v62 = vpop.permute.xlu1 %549 }
 0x57c   :  { %v711_v15 = vpop.f32.mrf.mxu0  ;;  %742 = vmax.xlane.f32.xlu1 %v741_v3  ;;  %v568_v3 = vmul.f32 %v3665_v18, %v3808_v62 }
 0x57d   :  { %v712_v30 = vadd.f32 %v711_v15, %v3777_v2  ;;  %v750_v39 = vsel %vm740_vm11, %v3775_v0, -inf  ;;  %v570_v15 = vmul.f32 %v3669_v20, %v3806_v10 }
 0x57e   :  { %v3140_v34 = vpop.f32.mrf.mxu0  ;;  %v3813_v63 = vpop.permute.xlu0 %547 }
 0x57f   :  { %v3785_v36 = vadd.f32 %v3140_v34, %v3782_v31  ;;  %v747_v38 = vsel %vm740_vm11, %v712_v30, -inf  ;;  %v3819_v29 = vpop.permute.xlu1 %545  ;;  %v567_v21 = vmul.f32 %v3813_v63, %v3667_v19 }
 0x580   :  { %v721_v40 = vpop.f32.mrf.mxu0  ;;  %748 = vmax.xlane.f32.xlu0 %v747_v38  ;;  %751 = vmax.xlane.f32.xlu1 %v750_v39  ;;  %v566_v34 = vmul.f32 %v3660_v16, %v3819_v29 }
 0x581   :  { %v722_v42 = vadd.f32 %v721_v40, %v3787_v37  ;;  %v756_v47 = vsel %vm740_vm11, %v3785_v36, -inf }
 0x582   :  { %v3143_v44 = vpop.f32.mrf.mxu0  ;;  %v3827_v35 = vpop.permute.xlu0 %543 }
 0x583   :  { %v737_v45 = vadd.f32 %v3143_v44, %v3793_v43  ;;  %v753_v46 = vsel %vm740_vm11, %v722_v42, -inf  ;;  %v565_v18 = vmul.f32 %v3827_v35, %v3663_v17  ;;  %v3836_v38 = vpop.permute.xlu1 %541 }
 0x584   :  { %754 = vmax.xlane.f32.xlu0 %v753_v46  ;;  %757 = vmax.xlane.f32.xlu1 %v756_v47  ;;  %v731_v50 = vpop.f32.mrf.mxu0 }
 0x585   :  { %v732_v52 = vadd.f32 %v731_v50, %v3799_v49  ;;  %v762_v53 = vsel %vm740_vm11, %v737_v45, -inf }
 0x586   :  { %v3834_v20 = vpop.permute.xlu0 %539 }
 0x587   :  { %v759_v56 = vsel %vm740_vm11, %v732_v52, -inf }
 0x588   :  { %763 = vmax.xlane.f32.xlu1 %v762_v53  ;;  %760 = vmax.xlane.f32.xlu0 %v759_v56 }
 0x599   :  { %849 = vrot.lane.b32.xlu1 %v569_v48, %s3559_s23 }
 0x59d   :  { %847 = vrot.lane.b32.xlu1 %v568_v3, %s3559_s23 }
 0x59e   :  { %851 = vrot.lane.b32.xlu0 %v570_v15, %s3559_s23 }
 0x5a1   :  { %843 = vrot.lane.b32.xlu1 %v566_v34, %s3559_s23 }
 0x5a2   :  { %845 = vrot.lane.b32.xlu0 %v567_v21, %s3559_s23 }
 0x5a6   :  { %841 = vrot.lane.b32.xlu0 %v565_v18, %s3559_s23 }
 0x603   :  { %v746_v39 = vpop.xlane.xlu0 %745 }
 0x604   :  { %v766_v16 = vsub.f32 %v3763_v54, %v746_v39 }
 0x605   :  { %v743_v40 = vpop.xlane.xlu1 %742 }
 0x606   :  { %v775_v19 = vmul.f32 1.442695, %v766_v16  ;;  %v765_v41 = vsub.f32 %v3768_v33, %v743_v40 }
 0x608   :  { %3445 = vpow2.f32 %v775_v19  ;;  %v773_v44 = vmul.f32 1.442695, %v765_v41 }
 0x609   :  { %v749_v46 = vpop.xlane.xlu0 %748  ;;  %v752_v47 = vpop.xlane.xlu1 %751 }
 0x60a   :  { %3447 = vpow2.f32 %v773_v44  ;;  %v767_v50 = vsub.f32 %v712_v30, %v749_v46  ;;  %v768_v17 = vsub.f32 %v3775_v0, %v752_v47 }
 0x60c   :  { %v777_v53 = vmul.f32 1.442695, %v767_v50  ;;  %v779_v56 = vmul.f32 1.442695, %v768_v17 }
 0x60d   :  { %v755_v48 = vpop.xlane.xlu0 %754  ;;  %v758_v3 = vpop.xlane.xlu1 %757 }
 0x60e   :  { %3449 = vpow2.f32 %v777_v53  ;;  %v769_v15 = vsub.f32 %v722_v42, %v755_v48  ;;  %v770_v54 = vsub.f32 %v3785_v36, %v758_v3 }
 0x60f   :  { %3451 = vpow2.f32 %v779_v56 }
 0x610   :  { %v781_v34 = vmul.f32 1.442695, %v769_v15  ;;  %v783_v21 = vmul.f32 1.442695, %v770_v54 }
 0x611   :  { %v764_v33 = vpop.xlane.xlu1 %763  ;;  %v761_v18 = vpop.xlane.xlu0 %760 }
 0x612   :  { %3453 = vpow2.f32 %v781_v34  ;;  %v772_v39 = vsub.f32 %v737_v45, %v764_v33  ;;  %v771_v16 = vsub.f32 %v732_v52, %v761_v18 }
 0x613   :  { %3455 = vpow2.f32 %v783_v21 }
 0x614   :  { %v787_v30 = vmul.f32 1.442695, %v772_v39  ;;  %v785_v40 = vmul.f32 1.442695, %v771_v16  ;;  %v564_v39 = vmul.f32 %v3652_v12, %v3836_v38  ;;  %v563_v16 = vmul.f32 %v3834_v20, %v3656_v14 }
 0x615   :  { %v3842_v0 = vpop.eup %3445  ;;  %v850_v19 = vpop.permute.xlu1 %849 }
 0x616   :  { %v852_v41 = vpop.permute.xlu0 %851  ;;  %3457 = vpow2.f32 %v787_v30  ;;  %v792_v36 = vsel %vm740_vm11, %v3842_v0, 0.0 }
 0x617   :  { %3144 = vmatprep.subr.mxu0 %v852_v41  ;;  %v3448_v42 = vpop.eup %3447  ;;  %3459 = vpow2.f32 %v785_v40  ;;  %793 = vadd.xlane.f32.xlu0 %v792_v36 }
 0x618   :  { %3145 = vmatpush3.msra.mxu0 %v852_v41  ;;  %v789_v45 = vsel %vm740_vm11, %v3448_v42, 0.0 }
 0x619   :  { %3146 = vmatprep.subr.mxu0 %v850_v19  ;;  %790 = vadd.xlane.f32.xlu1 %v789_v45  ;;  %v848_v52 = vpop.permute.xlu1 %847 }
 0x61a   :  { %3147 = vmatpush3.msra.mxu0 %v850_v19  ;;  %v846_v44 = vpop.permute.xlu0 %845 }
 0x61b   :  { %3148 = vmatprep.subr.mxu0 %v848_v52  ;;  %v3450_v46 = vpop.eup %3449 }
 0x61c   :  { %3149 = vmatpush3.msra.mxu0 %v848_v52  ;;  %v3847_v47 = vpop.eup %3451  ;;  %v795_v50 = vsel %vm740_vm11, %v3450_v46, 0.0 }
 0x61d   :  { %3150 = vmatprep.subr.mxu0 %v846_v44  ;;  %v798_v17 = vsel %vm740_vm11, %v3847_v47, 0.0  ;;  %v844_v53 = vpop.permute.xlu1 %843  ;;  %796 = vadd.xlane.f32.xlu0 %v795_v50 }
 0x61e   :  { %3151 = vmatpush3.msra.mxu0 %v846_v44  ;;  %799 = vadd.xlane.f32.xlu1 %v798_v17  ;;  %v842_v48 = vpop.permute.xlu0 %841 }
 0x61f   :  { %3152 = vmatprep.subr.mxu0 %v844_v53  ;;  %v3454_v56 = vpop.eup %3453 }
 0x620   :  { %3153 = vmatpush3.msra.mxu0 %v844_v53  ;;  %v3456_v3 = vpop.eup %3455  ;;  %v801_v15 = vsel %vm740_vm11, %v3454_v56, 0.0 }
 0x621   :  { %3154 = vmatprep.subr.mxu0 %v842_v48  ;;  %v804_v54 = vsel %vm740_vm11, %v3456_v3, 0.0  ;;  %802 = vadd.xlane.f32.xlu0 %v801_v15 }
 0x622   :  { %3155 = vmatpush3.msra.mxu0 %v842_v48  ;;  %805 = vadd.xlane.f32.xlu1 %v804_v54 }
 0x623   :  { %v3458_v34 = vpop.eup %3457 }
 0x624   :  { %v3460_v21 = vpop.eup %3459  ;;  %v810_v33 = vsel %vm740_vm11, %v3458_v34, 0.0 }
 0x625   :  { %v807_v18 = vsel %vm740_vm11, %v3460_v21, 0.0 }
 0x626   :  { %811 = vadd.xlane.f32.xlu1 %v810_v33  ;;  %808 = vadd.xlane.f32.xlu0 %v807_v18 }
 0x637   :  { %839 = vrot.lane.b32.xlu1 %v564_v39, %s3559_s23 }
 0x63c   :  { %837 = vrot.lane.b32.xlu0 %v563_v16, %s3559_s23 }
 0x6a0   :  { %v794_v30 = vpop.xlane.xlu0 %793 }
 0x6a2   :  { %v791_v40 = vpop.xlane.xlu1 %790 }
 0x6a3   :  { %3461 = vrcp.f32 %v791_v40 }
 0x6a4   :  { %3463 = vrcp.f32 %v794_v30 }
 0x6a6   :  { %v797_v19 = vpop.xlane.xlu0 %796 }
 0x6a7   :  { %v800_v41 = vpop.xlane.xlu1 %799  ;;  %3465 = vrcp.f32 %v797_v19 }
 0x6a8   :  { %3467 = vrcp.f32 %v800_v41 }
 0x6aa   :  { %v803_v36 = vpop.xlane.xlu0 %802 }
 0x6ab   :  { %v806_v45 = vpop.xlane.xlu1 %805  ;;  %3469 = vrcp.f32 %v803_v36 }
 0x6ac   :  { %3471 = vrcp.f32 %v806_v45 }
 0x6af   :  { %v812_v12 = vpop.xlane.xlu1 %811  ;;  %v809_v52 = vpop.xlane.xlu0 %808 }
 0x6b0   :  { %v3462_v44 = vpop.eup %3461  ;;  %3473 = vrcp.f32 %v809_v52 }
 0x6b1   :  { %v821_v50 = vmul.f32 %v3462_v44, %v3448_v42  ;;  %3475 = vrcp.f32 %v812_v12  ;;  %v3464_v14 = vpop.eup %3463 }
 0x6b2   :  { %v822_v54 = vmul.f32 %v3464_v14, %v3842_v0 }
 0x6b3   :  { %v840_v17 = vpop.permute.xlu1 %839  ;;  %3160 = vmatprep.mubr.msk.f32.mxu0 %vm740_vm11, %v821_v50  ;;  %v838_v48 = vpop.permute.xlu0 %837  ;;  %v1071_v50 = vld [vmem:[#allocation2 + $0x1f0] sm:$0xff] }
 0x6b4   :  { %v3466_v53 = vpop.eup %3465  ;;  %3156 = vmatprep.subr.mxu0 %v840_v17 }
 0x6b5   :  { %3157 = vmatpush3.msra.mxu0 %v840_v17  ;;  %v823_v15 = vmul.f32 %v3466_v53, %v3450_v46  ;;  %v3468_v33 = vpop.eup %3467  ;;  %v2811_v53 = vld [vmem:[#allocation2 + $0x210] ss:$0 sm:$0xff] }
 0x6b6   :  { %3158 = vmatprep.subr.mxu0 %v838_v48  ;;  %v824_v39 = vmul.f32 %v3468_v33, %v3847_v47 }
 0x6b7   :  { %3159 = vmatpush3.msra.mxu0 %v838_v48 }
 0x6b8   :  { %v3470_v18 = vpop.eup %3469  ;;  %3161 = vmatmul.mubr.msk.f32.vlgmr.msra.gmra.mxu0 %vm740_vm11, %v822_v54 }
 0x6b9   :  { %3163 = vmatprep.mubr.msk.f32.mxu0 %vm740_vm11, %v823_v15  ;;  %v825_v42 = vmul.f32 %v3470_v18, %v3454_v56  ;;  %v3472_v16 = vpop.eup %3471 }
 0x6ba   :  { %v826_v46 = vmul.f32 %v3472_v16, %v3456_v3  ;;  %v1074_v3 = vld [vmem:[#allocation2 + $0x208] sm:$0xff] }
 0x6bc   :  { %3164 = vmatmul.mubr.msk.f32.gmra.mxu0 %vm740_vm11, %v824_v39 }
 0x6bd   :  { %3166 = vmatprep.mubr.msk.f32.mxu0 %vm740_vm11, %v825_v42  ;;  %v3474_v30 = vpop.eup %3473 }
 0x6be   :  { %v3476_v40 = vpop.eup %3475  ;;  %v827_v0 = vmul.f32 %v3474_v30, %v3460_v21  ;;  %v1072_v21 = vld [vmem:[#allocation2 + $0x1f8] sm:$0xff] }
 0x6bf   :  { %v828_v19 = vmul.f32 %v3476_v40, %v3458_v34  ;;  %v1073_v34 = vld [vmem:[#allocation2 + $0x200] sm:$0xff] }
 0x6c0   :  { %3167 = vmatmul.mubr.msk.f32.gmra.mxu0 %vm740_vm11, %v826_v46 }
 0x6c1   :  { %3169 = vmatprep.mubr.msk.f32.mxu0 %vm740_vm11, %v827_v0 }
 0x6c4   :  { %3170 = vmatmul.mubr.msk.f32.gmra.mxu0 %vm740_vm11, %v828_v19 }
 0x778   :  { %v3162_v41 = vpop.f32.mrf.mxu0 }
 0x77a   :  { %v951_v56 = vpop.f32.mrf.mxu0 }
 0x77c   :  { %v3165_v36 = vpop.f32.mrf.mxu0 }
 0x77e   :  { %v961_v47 = vpop.f32.mrf.mxu0 }
 0x780   :  { %v3168_v45 = vpop.f32.mrf.mxu0 }
 0x782   :  { %v971_v12 = vpop.f32.mrf.mxu0 }
 0x784   :  { %v3171_v52 = vpop.f32.mrf.mxu0 }
 0x785   :  { %3172 = vmatprep.subr.mxu1 %v3171_v52 }
 0x786   :  { %v981_v44 = vpop.f32.mrf.mxu0  ;;  %3173 = vmatpush3.msra.mxu1 %v3171_v52  ;;  %v1302_v52 = vld [vmem:[#allocation2 + $0x288] sm:$0xff] }
 0x787   :  { %3174 = vmatprep.subr.mxu1 %v981_v44 }
 0x788   :  { %3175 = vmatpush3.msra.mxu1 %v981_v44  ;;  %v1301_v44 = vld [vmem:[#allocation2 + $0x280] sm:$0xff] }
 0x789   :  { %3176 = vmatprep.subr.mxu1 %v3168_v45 }
 0x78a   :  { %3177 = vmatpush3.msra.mxu1 %v3168_v45  ;;  %v1204_v45 = vld [vmem:[#allocation2 + $0x230] sm:$0xff] }
 0x78b   :  { %3178 = vmatprep.subr.mxu1 %v971_v12 }
 0x78c   :  { %3179 = vmatpush3.msra.mxu1 %v971_v12  ;;  %v1203_v12 = vld [vmem:[#allocation2 + $0x228] sm:$0xff] }
 0x78d   :  { %3180 = vmatprep.subr.mxu1 %v3165_v36 }
 0x78e   :  { %3181 = vmatpush3.msra.mxu1 %v3165_v36 }
 0x78f   :  { %3182 = vmatprep.subr.mxu1 %v961_v47 }
 0x790   :  { %3183 = vmatpush3.msra.mxu1 %v961_v47  ;;  %v1206_v47 = vld [vmem:[#allocation2 + $0x240] sm:$0xff] }
 0x791   :  { %3184 = vmatprep.subr.mxu1 %v3162_v41  ;;  %3202 = vmatprep.subr.mxu0 %v1206_v47 }
 0x792   :  { %3185 = vmatpush3.msra.mxu1 %v3162_v41  ;;  %3203 = vmatpush3.msra.mxu0 %v1206_v47 }
 0x793   :  { %3186 = vmatprep.subr.mxu1 %v951_v56 }
 0x794   :  { %3187 = vmatpush3.msra.mxu1 %v951_v56 }
 0x795   :  { %3189 = vmatmul.mubr.msk.f32.vlgmr.msra.gmra.mxu1 %vm740_vm11, %v3597_v32  ;;  %3191 = vmatprep.subr.mxu1 %v1074_v3 }
 0x796   :  { %3192 = vmatpush3.msra.mxu1 %v1074_v3  ;;  %v1300_v3 = vld [vmem:[#allocation2 + $0x278] sm:$0xff] }
 0x797   :  { %3193 = vmatprep.subr.mxu1 %v1073_v34 }
 0x798   :  { %3194 = vmatpush3.msra.mxu1 %v1073_v34  ;;  %v1299_v34 = vld [vmem:[#allocation2 + $0x270] sm:$0xff] }
 0x799   :  { %3195 = vmatprep.subr.mxu1 %v1072_v21 }
 0x79a   :  { %3196 = vmatpush3.msra.mxu1 %v1072_v21 }
 0x79b   :  { %3197 = vmatprep.subr.mxu1 %v1071_v50 }
 0x79c   :  { %3198 = vmatpush3.msra.mxu1 %v1071_v50 }
 0x79d   :  { %3213 = vmatprep.subr.mxu1 %v1302_v52 }
 0x855   :  { %v3190_v14 = vpop.f32.mrf.mxu1 }
 0x857   :  { %v1062_v17 = vpop.f32.mrf.mxu1 }
 0x858   :  { %3199 = vmatprep.mubr.msk.f32.mxu1 %vm147_vm8, %v1062_v17 }
 0x859   :  { %3200 = vmatmul.mubr.msk.f32.vlgmr.msra.gmra.mxu1 %vm147_vm8, %v3190_v14 }
 0x85a   :  { %3214 = vmatpush3.msra.mxu1 %v1302_v52  ;;  %v2819_v52 = vld [vmem:[#allocation2 + $0x290] ss:$0 sm:$0xff] }
 0x85b   :  { %3215 = vmatprep.subr.mxu1 %v1301_v44 }
 0x85c   :  { %3216 = vmatpush3.msra.mxu1 %v1301_v44 }
 0x85d   :  { %3217 = vmatprep.subr.mxu1 %v1300_v3 }
 0x85e   :  { %3218 = vmatpush3.msra.mxu1 %v1300_v3 }
 0x85f   :  { %3219 = vmatprep.subr.mxu1 %v1299_v34 }
 0x860   :  { %3220 = vmatpush3.msra.mxu1 %v1299_v34 }
 0x919   :  { %v3201_v48 = vpop.f32.mrf.mxu1 }
 0x91a   :  { %v1158_v15 = vadd.f32 %v3201_v48, %v2811_v53 }
 0x91b   :  { %v1152_v32 = vpop.f32.mrf.mxu1 }
 0x91c   :  { %v1153_v54 = vadd.f32 %v2811_v53, %v1152_v32  ;;  %v1162_v33 = vadd.f32 %v1158_v15, %v3612_v58  ;;  %v2814_v32 = vld [vmem:[#allocation2 + $0x218] ss:$0 sm:$0xff] }
 0x91e   :  { %v1168_v18 = vsel %vm147_vm8, %v1162_v33, 0.0  ;;  %v1161_v42 = vadd.f32 %v1153_v54, %v3610_v57  ;;  %v1205_v57 = vld [vmem:[#allocation2 + $0x238] sm:$0xff] }
 0x91f   :  { %1169 = vadd.xlane.f32.xlu0 %v1168_v18  ;;  %3204 = vmatprep.subr.mxu0 %v1205_v57 }
 0x920   :  { %v1165_v39 = vsel %vm147_vm8, %v1161_v42, 0.0  ;;  %3205 = vmatpush3.msra.mxu0 %v1205_v57 }
 0x921   :  { %1166 = vadd.xlane.f32.xlu1 %v1165_v39  ;;  %3206 = vmatprep.subr.mxu0 %v1204_v45  ;;  %v2815_v39 = vld [vmem:[#allocation2 + $0x220] ss:$0 sm:$0xff] }
 0x922   :  { %3207 = vmatpush3.msra.mxu0 %v1204_v45 }
 0x923   :  { %3208 = vmatprep.subr.mxu0 %v1203_v12 }
 0x924   :  { %3209 = vmatpush3.msra.mxu0 %v1203_v12 }
 0x9a8   :  { %v1170_v16 = vpop.xlane.xlu0 %1169 }
 0x9a9   :  { %v1172_v30 = vmul.f32 0.03125, %v1170_v16 }
 0x9aa   :  { %v1167_v46 = vpop.xlane.xlu1 %1166 }
 0x9ab   :  { %v1174_v40 = vsub.f32 %v1162_v33, %v1172_v30  ;;  %v1171_v0 = vmul.f32 0.03125, %v1167_v46 }
 0x9ad   :  { %v1173_v19 = vsub.f32 %v1161_v42, %v1171_v0  ;;  %v1176_v41 = vmul.f32 %v1174_v40, %v1174_v40  ;;  %v1298_v0 = vld [vmem:[#allocation2 + $0x268] sm:$0xff] }
 0x9ae   :  { %3221 = vmatprep.subr.mxu1 %v1298_v0 }
 0x9af   :  { %v1180_v56 = vsel %vm147_vm8, %v1176_v41, 0.0  ;;  %v1175_v36 = vmul.f32 %v1173_v19, %v1173_v19  ;;  %3222 = vmatpush3.msra.mxu1 %v1298_v0  ;;  %v1297_v41 = vld [vmem:[#allocation2 + $0x260] sm:$0xff] }
 0x9b0   :  { %1181 = vadd.xlane.f32.xlu1 %v1180_v56  ;;  %3223 = vmatprep.subr.mxu1 %v1297_v41  ;;  %v1296_v56 = vld [vmem:[#allocation2 + $0x258] sm:$0xff]  ;;  %v1434_v0 = vld [vmem:[#allocation2 + $0x2c0] sm:$0xff] }
 0x9b1   :  { %v1177_v58 = vsel %vm147_vm8, %v1175_v36, 0.0  ;;  %3224 = vmatpush3.msra.mxu1 %v1297_v41  ;;  %3232 = vmatprep.subr.mxu0 %v1434_v0  ;;  %v1432_v41 = vld [vmem:[#allocation2 + $0x2b0] sm:$0xff] }
 0x9b2   :  { %1178 = vadd.xlane.f32.xlu0 %v1177_v58  ;;  %3225 = vmatprep.subr.mxu1 %v1296_v56 }
 0x9b3   :  { %3226 = vmatpush3.msra.mxu1 %v1296_v56  ;;  %v1431_v56 = vld [vmem:[#allocation2 + $0x2a8] sm:$0xff] }
 0xa39   :  { %v1182_v21 = vpop.xlane.xlu1 %1181 }
 0xa3a   :  { %v1184_v50 = vmul.f32 0.03125, %v1182_v21 }
 0xa3b   :  { %v1179_v14 = vpop.xlane.xlu0 %1178 }
 0xa3c   :  { %v1186_v17 = vadd.f32 1e-05, %v1184_v50  ;;  %v1183_v53 = vmul.f32 0.03125, %v1179_v14 }
 0xa3e   :  { %3477 = vrsqrt.f32 %v1186_v17  ;;  %v1185_v48 = vadd.f32 1e-05, %v1183_v53 }
 0xa40   :  { %3479 = vrsqrt.f32 %v1185_v48 }
 0xa4b   :  { %v3478_v15 = vpop.eup %3477 }
 0xa4c   :  { %v1190_v54 = vmul.f32 %v3478_v15, %v1174_v40  ;;  %v1295_v40 = vld [vmem:[#allocation2 + $0x250] sm:$0xff] }
 0xa4d   :  { %v3480_v33 = vpop.eup %3479  ;;  %3227 = vmatprep.subr.mxu1 %v1295_v40 }
 0xa4e   :  { %v1189_v18 = vmul.f32 %v3480_v33, %v1173_v19  ;;  %v1196_v42 = vmul.f32 %v2814_v32, %v1190_v54  ;;  %3228 = vmatpush3.msra.mxu1 %v1295_v40  ;;  %v2816_v19 = vld [vmem:[#allocation2 + $0x248] ss:$0 sm:$0xff] }
 0xa50   :  { %v1195_v16 = vmul.f32 %v2814_v32, %v1189_v18  ;;  %v1202_v46 = vadd.f32 %v2815_v39, %v1196_v42 }
 0xa52   :  { %v1201_v30 = vadd.f32 %v2815_v39, %v1195_v16 }
 0xa54   :  { %3210 = vmatprep.mubr.msk.f32.mxu0 %vm147_vm8, %v1201_v30 }
 0xa55   :  { %3211 = vmatmul.mubr.msk.f32.vlgmr.msra.gmra.mxu0 %vm147_vm8, %v1202_v46 }
 0xa56   :  { %3233 = vmatpush3.msra.mxu0 %v1434_v0 }
 0xb15   :  { %v3212_v36 = vpop.f32.mrf.mxu0 }
 0xb16   :  { %v1290_v58 = vadd.f32 %v3212_v36, %v2816_v19 }
 0xb17   :  { %v1284_v47 = vpop.f32.mrf.mxu0 }
 0xb18   :  { %v1285_v57 = vadd.f32 %v2816_v19, %v1284_v47  ;;  %v1294_v12 = vmax.f32 %v1290_v58, 0.0 }
 0xb1a   :  { %v1293_v45 = vmax.f32 %v1285_v57, 0.0 }
 0xb1c   :  { %3229 = vmatprep.mubr.msk.f32.mxu1 %vm740_vm11, %v1293_v45 }
 0xb1d   :  { %3230 = vmatmul.mubr.msk.f32.vlgmr.msra.gmra.mxu1 %vm740_vm11, %v1294_v12  ;;  %v2822_v12 = vld [vmem:[#allocation2 + $0x298] ss:$0 sm:$0xff] }
 0xbdd   :  { %v3231_v44 = vpop.f32.mrf.mxu1 }
 0xbde   :  { %v1386_v3 = vadd.f32 %v3231_v44, %v2819_v52 }
 0xbdf   :  { %v1380_v34 = vpop.f32.mrf.mxu1 }
 0xbe0   :  { %v1381_v21 = vadd.f32 %v2819_v52, %v1380_v34  ;;  %v1390_v50 = vadd.f32 %v1386_v3, %v1202_v46 }
 0xbe2   :  { %v1396_v14 = vsel %vm147_vm8, %v1390_v50, 0.0  ;;  %v1389_v17 = vadd.f32 %v1381_v21, %v1201_v30  ;;  %v1433_v30 = vld [vmem:[#allocation2 + $0x2b8] sm:$0xff]  ;;  %v2823_v21 = vld [vmem:[#allocation2 + $0x2a0] ss:$0 sm:$0xff] }
 0xbe3   :  { %1397 = vadd.xlane.f32.xlu1 %v1396_v14  ;;  %3234 = vmatprep.subr.mxu0 %v1433_v30 }
 0xbe4   :  { %v1393_v53 = vsel %vm147_vm8, %v1389_v17, 0.0  ;;  %3235 = vmatpush3.msra.mxu0 %v1433_v30 }
 0xbe5   :  { %1394 = vadd.xlane.f32.xlu0 %v1393_v53  ;;  %3236 = vmatprep.subr.mxu0 %v1432_v41  ;;  %v2824_v53 = vld [vmem:[#allocation2 + $0x2c8] ss:$0 sm:$0xff] }
 0xbe6   :  { %3237 = vmatpush3.msra.mxu0 %v1432_v41 }
 0xbe7   :  { %3238 = vmatprep.subr.mxu0 %v1431_v56 }
 0xbe8   :  { %3239 = vmatpush3.msra.mxu0 %v1431_v56 }
 0xc6c   :  { %v1398_v48 = vpop.xlane.xlu1 %1397 }
 0xc6d   :  { %v1400_v15 = vmul.f32 0.03125, %v1398_v48 }
 0xc6e   :  { %v1395_v32 = vpop.xlane.xlu0 %1394 }
 0xc6f   :  { %v1402_v54 = vsub.f32 %v1390_v50, %v1400_v15  ;;  %v1399_v33 = vmul.f32 0.03125, %v1395_v32 }
 0xc71   :  { %v1401_v18 = vsub.f32 %v1389_v17, %v1399_v33  ;;  %v1404_v42 = vmul.f32 %v1402_v54, %v1402_v54 }
 0xc73   :  { %v1408_v39 = vsel %vm147_vm8, %v1404_v42, 0.0  ;;  %v1403_v16 = vmul.f32 %v1401_v18, %v1401_v18 }
 0xc74   :  { %1409 = vadd.xlane.f32.xlu1 %v1408_v39 }
 0xc75   :  { %v1405_v46 = vsel %vm147_vm8, %v1403_v16, 0.0 }
 0xc76   :  { %1406 = vadd.xlane.f32.xlu0 %v1405_v46 }
 0xcfd   :  { %v1410_v40 = vpop.xlane.xlu1 %1409 }
 0xcfe   :  { %v1412_v19 = vmul.f32 0.03125, %v1410_v40 }
 0xcff   :  { %v1407_v36 = vpop.xlane.xlu0 %1406 }
 0xd00   :  { %v1414_v58 = vadd.f32 1e-05, %v1412_v19  ;;  %v1411_v47 = vmul.f32 0.03125, %v1407_v36 }
 0xd02   :  { %3481 = vrsqrt.f32 %v1414_v58  ;;  %v1413_v57 = vadd.f32 1e-05, %v1411_v47 }
 0xd04   :  { %3483 = vrsqrt.f32 %v1413_v57 }
 0xd0f   :  { %v3482_v45 = vpop.eup %3481 }
 0xd10   :  { %v1418_v52 = vmul.f32 %v3482_v45, %v1402_v54 }
 0xd11   :  { %v3484_v44 = vpop.eup %3483 }
 0xd12   :  { %v1417_v3 = vmul.f32 %v3484_v44, %v1401_v18  ;;  %v1424_v34 = vmul.f32 %v2822_v12, %v1418_v52 }
 0xd14   :  { %v1423_v50 = vmul.f32 %v2822_v12, %v1417_v3  ;;  %v3892_v17 = vadd.f32 %v2823_v21, %v1424_v34 }
 0xd16   :  { %v3890_v14 = vadd.f32 %v2823_v21, %v1423_v50 }
 0xd18   :  { %3240 = vmatprep.mubr.msk.f32.mxu0 %vm147_vm8, %v3890_v14 }
 0xd19   :  { %3241 = vmatmul.mubr.msk.f32.vlgmr.msra.gmra.mxu0 %vm147_vm8, %v3892_v17 }
 0xd1a   :  { %3247 = vmatprep.mubr.msk.f32.mxu0 %vm210_vm10, %v3620_v61 }
 0xdd9   :  { %v3242_v48 = vpop.f32.mrf.mxu0 }
 0xdda   :  { %v1518_v15 = vadd.f32 %v3242_v48, %v2824_v53 }
 0xddb   :  { %v1512_v32 = vpop.f32.mrf.mxu0 }
 0xddc   :  { %v1513_v54 = vadd.f32 %v2824_v53, %v1512_v32  ;;  %3243 = vmatprep.subr.mxu0 %v1518_v15 }
 0xddd   :  { %3244 = vmatpush3.msra.mxu0 %v1518_v15 }
 0xdde   :  { %3245 = vmatprep.subr.mxu0 %v1513_v54 }
 0xddf   :  { %3246 = vmatpush3.msra.mxu0 %v1513_v54 }
 0xde0   :  { %3248 = vmatmul.mubr.msk.f32.vlgmr.msra.gmra.mxu0 %vm210_vm10, %v3624_v4 }
 0xde1   :  { %3250 = vmatprep.mubr.msk.f32.mxu0 %vm210_vm10, %v3626_v5 }
 0xde4   :  { %3251 = vmatmul.mubr.msk.f32.gmra.mxu0 %vm210_vm10, %v3632_v6 }
 0xde5   :  { %3253 = vmatprep.mubr.msk.f32.mxu0 %vm210_vm10, %v3634_v7 }
 0xde8   :  { %3254 = vmatmul.mubr.msk.f32.gmra.mxu0 %vm210_vm10, %v3640_v8 }
 0xde9   :  { %3256 = vmatprep.mubr.msk.f32.mxu0 %vm210_vm10, %v3642_v9 }
 0xdec   :  { %3257 = vmatmul.mubr.msk.f32.gmra.mxu0 %vm210_vm10, %v3648_v11 }
 0xea0   :  { %v3914_v61 = vpop.f32.mrf.mxu0 }
 0xea1   :  { %v1627_v41 = vmul.f32 %v3914_v61, %v3715_v28 }
 0xea2   :  { %v3916_v4 = vpop.f32.mrf.mxu0 }
 0xea3   :  { %v1626_v5 = vmul.f32 %v3916_v4, %v3654_v13 }
 0xea4   :  { %v3920_v6 = vpop.f32.mrf.mxu0 }
 0xea5   :  { %3275 = vmatprep.mubr.msk.f32.mxu1 %vm147_vm8, %v1626_v5  ;;  %v1629_v40 = vmul.f32 %v3920_v6, %v3709_v27 }
 0xea6   :  { %v3923_v7 = vpop.f32.mrf.mxu0 }
 0xea7   :  { %v1628_v56 = vmul.f32 %v3923_v7, %v3705_v26 }
 0xea8   :  { %v3925_v8 = vpop.f32.mrf.mxu0 }
 0xea9   :  { %v1631_v28 = vmul.f32 %v3925_v8, %v3701_v25 }
 0xeaa   :  { %v3927_v33 = vpop.f32.mrf.mxu0 }
 0xeab   :  { %v1630_v19 = vmul.f32 %v3927_v33, %v3697_v24  ;;  %v1638_v54 = vmul.f32 %v3927_v33, %v3813_v63 }
 0xeac   :  { %v3929_v9 = vpop.f32.mrf.mxu0 }
 0xead   :  { %1664 = vrot.lane.b32.xlu0 %v3929_v9, %s3558_s1  ;;  %v1633_v27 = vmul.f32 %v3929_v9, %v3689_v22  ;;  %v1641_v32 = vmul.f32 %v3929_v9, %v3806_v10 }
 0xeae   :  { %v3933_v11 = vpop.f32.mrf.mxu0 }
 0xeaf   :  { %1662 = vrot.lane.b32.xlu1 %v3933_v11, %s3558_s1  ;;  %v1632_v26 = vmul.f32 %v3933_v11, %v3693_v23 }
 0xeb1   :  { %1658 = vrot.lane.b32.xlu0 %v3927_v33, %s3558_s1 }
 0xeb3   :  { %1660 = vrot.lane.b32.xlu1 %v3925_v8, %s3558_s1 }
 0xeb5   :  { %1654 = vrot.lane.b32.xlu0 %v3923_v7, %s3558_s1 }
 0xeb7   :  { %1656 = vrot.lane.b32.xlu1 %v3920_v6, %s3558_s1 }
 0xeb9   :  { %1650 = vrot.lane.b32.xlu0 %v3916_v4, %s3558_s1 }
 0xebb   :  { %1652 = vrot.lane.b32.xlu1 %v3914_v61, %s3558_s1 }
 0xf1f   :  { %v1665_v13 = vpop.permute.xlu0 %1664 }
 0xf20   :  { %3259 = vmatprep.subr.msk.mxu1 %vm147_vm8, %v1665_v13 }
 0xf21   :  { %3260 = vmatpush3.xpose.msk.msra.mxu1 %vm147_vm8, %v1665_v13  ;;  %v1663_v18 = vpop.permute.xlu1 %1662 }
 0xf22   :  { %3261 = vmatprep.subr.msk.mxu1 %vm147_vm8, %v1663_v18 }
 0xf23   :  { %v1659_v39 = vpop.permute.xlu0 %1658 }
 0xf25   :  { %3262 = vmatpush3.xpose.msk.msra.mxu1 %vm147_vm8, %v1663_v18  ;;  %v1661_v42 = vpop.permute.xlu1 %1660 }
 0xf26   :  { %3263 = vmatprep.subr.msk.mxu1 %vm147_vm8, %v1661_v42 }
 0xf27   :  { %v1655_v46 = vpop.permute.xlu0 %1654 }
 0xf29   :  { %3264 = vmatpush3.xpose.msk.msra.mxu1 %vm147_vm8, %v1661_v42  ;;  %v1657_v16 = vpop.permute.xlu1 %1656 }
 0xf2a   :  { %3265 = vmatprep.subr.msk.mxu1 %vm147_vm8, %v1659_v39 }
 0xf2b   :  { %v1651_v30 = vpop.permute.xlu0 %1650 }
 0xf2d   :  { %3266 = vmatpush3.xpose.msk.msra.mxu1 %vm147_vm8, %v1659_v39  ;;  %v1653_v0 = vpop.permute.xlu1 %1652 }
 0xf2e   :  { %3267 = vmatprep.subr.msk.mxu1 %vm147_vm8, %v1657_v16 }
 0xf31   :  { %3268 = vmatpush3.xpose.msk.msra.mxu1 %vm147_vm8, %v1657_v16 }
 0xf32   :  { %3269 = vmatprep.subr.msk.mxu1 %vm147_vm8, %v1655_v46 }
 0xf35   :  { %3270 = vmatpush3.xpose.msk.msra.mxu1 %vm147_vm8, %v1655_v46 }
 0xf36   :  { %3271 = vmatprep.subr.msk.mxu1 %vm147_vm8, %v1653_v0 }
 0xf39   :  { %3272 = vmatpush3.xpose.msk.msra.mxu1 %vm147_vm8, %v1653_v0 }
 0xf3a   :  { %3273 = vmatprep.subr.msk.mxu1 %vm147_vm8, %v1651_v30 }
 0xf3d   :  { %3274 = vmatpush3.xpose.msk.msra.mxu1 %vm147_vm8, %v1651_v30 }
 0xf40   :  { %3276 = vmatmul.mubr.msk.f32.vlgmr.msra.gmra.mxu1 %vm147_vm8, %v1627_v41 }
 0xf41   :  { %3278 = vmatprep.mubr.msk.f32.mxu1 %vm147_vm8, %v1628_v56 }
 0xf44   :  { %3279 = vmatmul.mubr.msk.f32.gmra.mxu1 %vm147_vm8, %v1629_v40 }
 0xf45   :  { %3281 = vmatprep.mubr.msk.f32.mxu1 %vm147_vm8, %v1630_v19 }
 0xf48   :  { %3282 = vmatmul.mubr.msk.f32.gmra.mxu1 %vm147_vm8, %v1631_v28 }
 0xf49   :  { %3284 = vmatprep.mubr.msk.f32.mxu1 %vm147_vm8, %v1632_v26 }
 0xf4c   :  { %3285 = vmatmul.mubr.msk.f32.gmra.mxu1 %vm147_vm8, %v1633_v27 }
0x1000   :  { %v3277_v24 = vpop.f32.mrf.mxu1 }
0x1001   :  { %v1778_v36 = vadd.f32 %v3277_v24, %v3760_v51 }
0x1002   :  { %v1772_v58 = vpop.f32.mrf.mxu1 }
0x1003   :  { %v1773_v47 = vadd.f32 %v1772_v58, %v3765_v55  ;;  %v1814_v25 = vsel %vm740_vm11, %v1778_v36, -inf }
0x1004   :  { %1815 = vmax.xlane.f32.xlu0 %v1814_v25  ;;  %v3280_v57 = vpop.f32.mrf.mxu1 }
0x1005   :  { %v1788_v23 = vadd.f32 %v3280_v57, %v3772_v59  ;;  %v1811_v45 = vsel %vm740_vm11, %v1773_v47, -inf }
0x1006   :  { %v1782_v12 = vpop.f32.mrf.mxu1  ;;  %1812 = vmax.xlane.f32.xlu1 %v1811_v45 }
0x1007   :  { %v1783_v22 = vadd.f32 %v1782_v12, %v3777_v2  ;;  %v1820_v3 = vsel %vm740_vm11, %v1788_v23, -inf }
0x1008   :  { %v3283_v52 = vpop.f32.mrf.mxu1 }
0x1009   :  { %v1798_v44 = vadd.f32 %v3283_v52, %v3782_v31  ;;  %v1817_v51 = vsel %vm740_vm11, %v1783_v22, -inf }
0x100a   :  { %v1792_v55 = vpop.f32.mrf.mxu1  ;;  %1818 = vmax.xlane.f32.xlu0 %v1817_v51  ;;  %1821 = vmax.xlane.f32.xlu1 %v1820_v3 }
0x100b   :  { %v1793_v34 = vadd.f32 %v1792_v55, %v3787_v37  ;;  %v1826_v53 = vsel %vm740_vm11, %v1798_v44, -inf  ;;  %v1640_v37 = vmul.f32 %v3933_v11, %v3804_v60  ;;  %v1636_v60 = vmul.f32 %v3923_v7, %v3827_v35 }
0x100c   :  { %v3286_v21 = vpop.f32.mrf.mxu1 }
0x100d   :  { %v1808_v59 = vadd.f32 %v3286_v21, %v3793_v43  ;;  %v1823_v50 = vsel %vm740_vm11, %v1793_v34, -inf  ;;  %v1639_v43 = vmul.f32 %v3925_v8, %v3808_v62 }
0x100e   :  { %1824 = vmax.xlane.f32.xlu0 %v1823_v50  ;;  %1827 = vmax.xlane.f32.xlu1 %v1826_v53  ;;  %v1802_v2 = vpop.f32.mrf.mxu1  ;;  %v1635_v53 = vmul.f32 %v3914_v61, %v3836_v38 }
0x100f   :  { %v1803_v31 = vadd.f32 %v1802_v2, %v3799_v49  ;;  %v1832_v48 = vsel %vm740_vm11, %v1808_v59, -inf  ;;  %v1637_v49 = vmul.f32 %v3920_v6, %v3819_v29  ;;  %v1634_v2 = vmul.f32 %v3916_v4, %v3834_v20 }
0x1011   :  { %v1829_v15 = vsel %vm740_vm11, %v1803_v31, -inf }
0x1012   :  { %1833 = vmax.xlane.f32.xlu1 %v1832_v48  ;;  %1830 = vmax.xlane.f32.xlu0 %v1829_v15 }
0x1023   :  { %1919 = vrot.lane.b32.xlu1 %v1640_v37, %s3559_s23 }
0x1027   :  { %1917 = vrot.lane.b32.xlu1 %v1639_v43, %s3559_s23 }
0x1028   :  { %1921 = vrot.lane.b32.xlu0 %v1641_v32, %s3559_s23 }
0x102b   :  { %1913 = vrot.lane.b32.xlu1 %v1637_v49, %s3559_s23 }
0x102c   :  { %1915 = vrot.lane.b32.xlu0 %v1638_v54, %s3559_s23 }
0x1030   :  { %1911 = vrot.lane.b32.xlu0 %v1636_v60, %s3559_s23 }
0x108d   :  { %v1816_v10 = vpop.xlane.xlu0 %1815 }
0x108e   :  { %v1836_v62 = vsub.f32 %v1778_v36, %v1816_v10 }
0x108f   :  { %v1813_v5 = vpop.xlane.xlu1 %1812 }
0x1090   :  { %v1845_v8 = vmul.f32 1.442695, %v1836_v62  ;;  %v1835_v9 = vsub.f32 %v1773_v47, %v1813_v5 }
0x1092   :  { %3485 = vpow2.f32 %v1845_v8  ;;  %v1843_v11 = vmul.f32 1.442695, %v1835_v9 }
0x1093   :  { %v1819_v29 = vpop.xlane.xlu0 %1818  ;;  %v1822_v6 = vpop.xlane.xlu1 %1821 }
0x1094   :  { %3487 = vpow2.f32 %v1843_v11  ;;  %v1837_v63 = vsub.f32 %v1783_v22, %v1819_v29  ;;  %v1838_v33 = vsub.f32 %v1788_v23, %v1822_v6 }
0x1096   :  { %v1847_v13 = vmul.f32 1.442695, %v1837_v63  ;;  %v1849_v18 = vmul.f32 1.442695, %v1838_v33 }
0x1097   :  { %v1825_v42 = vpop.xlane.xlu0 %1824  ;;  %v1828_v39 = vpop.xlane.xlu1 %1827 }
0x1098   :  { %3489 = vpow2.f32 %v1847_v13  ;;  %v1839_v35 = vsub.f32 %v1793_v34, %v1825_v42  ;;  %v1840_v7 = vsub.f32 %v1798_v44, %v1828_v39  ;;  %v3527_v39 = vld [vmem:[#allocation2 + $0x58] sm:$0xff] }
0x1099   :  { %3491 = vpow2.f32 %v1849_v18 }
0x109a   :  { %v1851_v16 = vmul.f32 1.442695, %v1839_v35  ;;  %v1853_v46 = vmul.f32 1.442695, %v1840_v7 }
0x109b   :  { %v1834_v0 = vpop.xlane.xlu1 %1833  ;;  %v1831_v30 = vpop.xlane.xlu0 %1830 }
0x109c   :  { %3493 = vpow2.f32 %v1851_v16  ;;  %v1842_v41 = vsub.f32 %v1808_v59, %v1834_v0  ;;  %v1841_v56 = vsub.f32 %v1803_v31, %v1831_v30 }
0x109d   :  { %3495 = vpow2.f32 %v1853_v46 }
0x109e   :  { %v1857_v40 = vmul.f32 1.442695, %v1842_v41  ;;  %v1855_v19 = vmul.f32 1.442695, %v1841_v56 }
0x109f   :  { %v4020_v28 = vpop.eup %3485  ;;  %v1920_v26 = vpop.permute.xlu1 %1919 }
0x10a0   :  { %v1922_v27 = vpop.permute.xlu0 %1921  ;;  %3497 = vpow2.f32 %v1857_v40  ;;  %v1862_v24 = vsel %vm740_vm11, %v4020_v28, 0.0  ;;  %v2138_v40 = vld [vmem:[#allocation2 + $0x2e8] sm:$0xff] }
0x10a1   :  { %3287 = vmatprep.subr.mxu0 %v1922_v27  ;;  %v3488_v36 = vpop.eup %3487  ;;  %3499 = vpow2.f32 %v1855_v19  ;;  %1863 = vadd.xlane.f32.xlu1 %v1862_v24  ;;  %v2137_v19 = vld [vmem:[#allocation2 + $0x2e0] sm:$0xff] }
0x10a2   :  { %3288 = vmatpush3.msra.mxu0 %v1922_v27  ;;  %v1859_v58 = vsel %vm740_vm11, %v3488_v36, 0.0  ;;  %v2135_v27 = vld [vmem:[#allocation2 + $0x2d0] sm:$0xff] }
0x10a3   :  { %3289 = vmatprep.subr.mxu0 %v1920_v26  ;;  %v1918_v47 = vpop.permute.xlu1 %1917  ;;  %1860 = vadd.xlane.f32.xlu0 %v1859_v58  ;;  %v2861_v58 = vld [vmem:[#allocation2 + $0x2f0] ss:$0 sm:$0xff] }
0x10a4   :  { %3290 = vmatpush3.msra.mxu0 %v1920_v26  ;;  %v1916_v25 = vpop.permute.xlu0 %1915  ;;  %v2136_v26 = vld [vmem:[#allocation2 + $0x2d8] sm:$0xff] }
0x10a5   :  { %3291 = vmatprep.subr.mxu0 %v1918_v47  ;;  %v3490_v57 = vpop.eup %3489 }
0x10a6   :  { %3292 = vmatpush3.msra.mxu0 %v1918_v47  ;;  %v4025_v23 = vpop.eup %3491  ;;  %v1865_v45 = vsel %vm740_vm11, %v3490_v57, 0.0 }
0x10a7   :  { %3293 = vmatprep.subr.mxu0 %v1916_v25  ;;  %v1868_v12 = vsel %vm740_vm11, %v4025_v23, 0.0  ;;  %v1914_v22 = vpop.permute.xlu1 %1913  ;;  %1866 = vadd.xlane.f32.xlu0 %v1865_v45 }
0x10a8   :  { %3294 = vmatpush3.msra.mxu0 %v1916_v25  ;;  %1869 = vadd.xlane.f32.xlu1 %v1868_v12  ;;  %v1912_v44 = vpop.permute.xlu0 %1911 }
0x10a9   :  { %3295 = vmatprep.subr.mxu0 %v1914_v22  ;;  %v3494_v52 = vpop.eup %3493 }
0x10aa   :  { %3296 = vmatpush3.msra.mxu0 %v1914_v22  ;;  %v3496_v51 = vpop.eup %3495  ;;  %v1871_v3 = vsel %vm740_vm11, %v3494_v52, 0.0 }
0x10ab   :  { %3297 = vmatprep.subr.mxu0 %v1912_v44  ;;  %v1874_v55 = vsel %vm740_vm11, %v3496_v51, 0.0  ;;  %1872 = vadd.xlane.f32.xlu0 %v1871_v3 }
0x10ac   :  { %3298 = vmatpush3.msra.mxu0 %v1912_v44  ;;  %1875 = vadd.xlane.f32.xlu1 %v1874_v55 }
0x10ad   :  { %v3498_v34 = vpop.eup %3497 }
0x10ae   :  { %v3500_v21 = vpop.eup %3499  ;;  %v1880_v59 = vsel %vm740_vm11, %v3498_v34, 0.0 }
0x10af   :  { %v1877_v50 = vsel %vm740_vm11, %v3500_v21, 0.0 }
0x10b0   :  { %1881 = vadd.xlane.f32.xlu1 %v1880_v59  ;;  %1878 = vadd.xlane.f32.xlu0 %v1877_v50 }
0x10c1   :  { %1909 = vrot.lane.b32.xlu1 %v1635_v53, %s3559_s23 }
0x10c6   :  { %1907 = vrot.lane.b32.xlu0 %v1634_v2, %s3559_s23  ;;  %v2270_v2 = vld [vmem:[#allocation2 + $0x320] sm:$0xff] }
0x10c7   :  { %3345 = vmatprep.subr.mxu1 %v2270_v2 }
0x10c8   :  { %3346 = vmatpush3.msra.mxu1 %v2270_v2 }
0x112a   :  { %v1864_v48 = vpop.xlane.xlu1 %1863 }
0x112c   :  { %v1861_v31 = vpop.xlane.xlu0 %1860 }
0x112d   :  { %3501 = vrcp.f32 %v1861_v31  ;;  %v2268_v31 = vld [vmem:[#allocation2 + $0x310] sm:$0xff] }
0x112e   :  { %3503 = vrcp.f32 %v1864_v48  ;;  %v2267_v48 = vld [vmem:[#allocation2 + $0x308] sm:$0xff] }
0x1130   :  { %v1867_v15 = vpop.xlane.xlu0 %1866 }
0x1131   :  { %v1870_v37 = vpop.xlane.xlu1 %1869  ;;  %3505 = vrcp.f32 %v1867_v15  ;;  %v2366_v15 = vld [vmem:[#allocation2 + $0x368] sm:$0xff] }
0x1132   :  { %3507 = vrcp.f32 %v1870_v37  ;;  %v2365_v37 = vld [vmem:[#allocation2 + $0x360] sm:$0xff] }
0x1134   :  { %v1873_v43 = vpop.xlane.xlu0 %1872 }
0x1135   :  { %v1876_v32 = vpop.xlane.xlu1 %1875  ;;  %3509 = vrcp.f32 %v1873_v43  ;;  %v2364_v43 = vld [vmem:[#allocation2 + $0x358] sm:$0xff] }
0x1136   :  { %3511 = vrcp.f32 %v1876_v32  ;;  %v2363_v32 = vld [vmem:[#allocation2 + $0x350] sm:$0xff] }
0x1139   :  { %v1882_v38 = vpop.xlane.xlu1 %1881  ;;  %v1879_v61 = vpop.xlane.xlu0 %1878 }
0x113a   :  { %v3502_v49 = vpop.eup %3501  ;;  %3513 = vrcp.f32 %v1879_v61 }
0x113b   :  { %v1891_v54 = vmul.f32 %v3502_v49, %v3488_v36  ;;  %3515 = vrcp.f32 %v1882_v38  ;;  %v3504_v20 = vpop.eup %3503 }
0x113c   :  { %v1892_v5 = vmul.f32 %v3504_v20, %v4020_v28  ;;  %v3528_v28 = vld [vmem:[#allocation2 + $0x60] sm:$0xff] }
0x113d   :  { %v1910_v4 = vpop.permute.xlu1 %1909  ;;  %3303 = vmatprep.mubr.msk.f32.mxu0 %vm740_vm11, %v1891_v54  ;;  %v1908_v10 = vpop.permute.xlu0 %1907 }
0x113e   :  { %v3506_v60 = vpop.eup %3505  ;;  %3299 = vmatprep.subr.mxu0 %v1910_v4 }
0x113f   :  { %3300 = vmatpush3.msra.mxu0 %v1910_v4  ;;  %v1893_v62 = vmul.f32 %v3506_v60, %v3490_v57  ;;  %v3508_v8 = vpop.eup %3507 }
0x1140   :  { %3301 = vmatprep.subr.mxu0 %v1908_v10  ;;  %v1894_v29 = vmul.f32 %v3508_v8, %v4025_v23 }
0x1141   :  { %3302 = vmatpush3.msra.mxu0 %v1908_v10  ;;  %v2864_v10 = vld [vmem:[#allocation2 + $0x2f8] ss:$0 sm:$0xff] }
0x1142   :  { %v3510_v9 = vpop.eup %3509  ;;  %3304 = vmatmul.mubr.msk.f32.vlgmr.msra.gmra.mxu0 %vm740_vm11, %v1892_v5 }
0x1143   :  { %3306 = vmatprep.mubr.msk.f32.mxu0 %vm740_vm11, %v1893_v62  ;;  %v1895_v11 = vmul.f32 %v3510_v9, %v3494_v52  ;;  %v3512_v6 = vpop.eup %3511 }
0x1144   :  { %v1896_v33 = vmul.f32 %v3512_v6, %v3496_v51 }
0x1146   :  { %3307 = vmatmul.mubr.msk.f32.gmra.mxu0 %vm740_vm11, %v1894_v29 }
0x1147   :  { %3309 = vmatprep.mubr.msk.f32.mxu0 %vm740_vm11, %v1895_v11  ;;  %v3514_v63 = vpop.eup %3513  ;;  %v2865_v11 = vld [vmem:[#allocation2 + $0x300] ss:$0 sm:$0xff] }
0x1148   :  { %v3516_v13 = vpop.eup %3515  ;;  %v1897_v18 = vmul.f32 %v3514_v63, %v3500_v21 }
0x1149   :  { %v1898_v42 = vmul.f32 %v3516_v13, %v3498_v34  ;;  %v2361_v13 = vld [vmem:[#allocation2 + $0x340] sm:$0xff] }
0x114a   :  { %3310 = vmatmul.mubr.msk.f32.gmra.mxu0 %vm740_vm11, %v1896_v33  ;;  %v2362_v33 = vld [vmem:[#allocation2 + $0x348] sm:$0xff] }
0x114b   :  { %3312 = vmatprep.mubr.msk.f32.mxu0 %vm740_vm11, %v1897_v18  ;;  %v2360_v18 = vld [vmem:[#allocation2 + $0x338] sm:$0xff] }
0x114e   :  { %3313 = vmatmul.mubr.msk.f32.gmra.mxu0 %vm740_vm11, %v1898_v42  ;;  %v2359_v42 = vld [vmem:[#allocation2 + $0x330] sm:$0xff] }
0x114f   :  { %3331 = vmatprep.mubr.msk.f32.mxu0 %vm740_vm11, %v3527_v39  ;;  %v2866_v39 = vld [vmem:[#allocation2 + $0x328] ss:$0 sm:$0xff] }
0x1202   :  { %v3305_v35 = vpop.f32.mrf.mxu0 }
0x1204   :  { %v2021_v7 = vpop.f32.mrf.mxu0 }
0x1206   :  { %v3308_v16 = vpop.f32.mrf.mxu0 }
0x1208   :  { %v2031_v46 = vpop.f32.mrf.mxu0 }
0x120a   :  { %v3311_v0 = vpop.f32.mrf.mxu0 }
0x120c   :  { %v2041_v30 = vpop.f32.mrf.mxu0 }
0x120e   :  { %v3314_v41 = vpop.f32.mrf.mxu0 }
0x120f   :  { %3315 = vmatprep.subr.mxu0 %v3314_v41 }
0x1210   :  { %v2051_v56 = vpop.f32.mrf.mxu0  ;;  %3316 = vmatpush3.msra.mxu0 %v3314_v41  ;;  %v2869_v41 = vld [vmem:[#allocation2 + $0x370] ss:$0 sm:$0xff] }
0x1211   :  { %3317 = vmatprep.subr.mxu0 %v2051_v56 }
0x1212   :  { %3318 = vmatpush3.msra.mxu0 %v2051_v56 }
0x1213   :  { %3319 = vmatprep.subr.mxu0 %v3311_v0 }
0x1214   :  { %3320 = vmatpush3.msra.mxu0 %v3311_v0 }
0x1215   :  { %3321 = vmatprep.subr.mxu0 %v2041_v30 }
0x1216   :  { %3322 = vmatpush3.msra.mxu0 %v2041_v30 }
0x1217   :  { %3323 = vmatprep.subr.mxu0 %v3308_v16 }
0x1218   :  { %3324 = vmatpush3.msra.mxu0 %v3308_v16 }
0x1219   :  { %3325 = vmatprep.subr.mxu0 %v2031_v46 }
0x121a   :  { %3326 = vmatpush3.msra.mxu0 %v2031_v46 }
0x121b   :  { %3327 = vmatprep.subr.mxu0 %v3305_v35 }
0x121c   :  { %3328 = vmatpush3.msra.mxu0 %v3305_v35 }
0x121d   :  { %3329 = vmatprep.subr.mxu0 %v2021_v7 }
0x121e   :  { %3330 = vmatpush3.msra.mxu0 %v2021_v7 }
0x121f   :  { %3332 = vmatmul.mubr.msk.f32.vlgmr.msra.gmra.mxu0 %vm740_vm11, %v3528_v28  ;;  %3334 = vmatprep.subr.mxu0 %v2138_v40 }
0x1220   :  { %3335 = vmatpush3.msra.mxu0 %v2138_v40 }
0x1221   :  { %3336 = vmatprep.subr.mxu0 %v2137_v19 }
0x1222   :  { %3337 = vmatpush3.msra.mxu0 %v2137_v19 }
0x1223   :  { %3338 = vmatprep.subr.mxu0 %v2136_v26 }
0x1224   :  { %3339 = vmatpush3.msra.mxu0 %v2136_v26 }
0x1225   :  { %3340 = vmatprep.subr.mxu0 %v2135_v27 }
0x1226   :  { %3341 = vmatpush3.msra.mxu0 %v2135_v27 }
0x1227   :  { %3356 = vmatprep.subr.mxu0 %v2366_v15 }
0x12df   :  { %v3333_v24 = vpop.f32.mrf.mxu0 }
0x12e1   :  { %v2126_v36 = vpop.f32.mrf.mxu0 }
0x12e2   :  { %3342 = vmatprep.mubr.msk.f32.mxu0 %vm147_vm8, %v2126_v36 }
0x12e3   :  { %3343 = vmatmul.mubr.msk.f32.vlgmr.msra.gmra.mxu0 %vm147_vm8, %v3333_v24 }
0x12e4   :  { %3357 = vmatpush3.msra.mxu0 %v2366_v15 }
0x12e5   :  { %3358 = vmatprep.subr.mxu0 %v2365_v37 }
0x12e6   :  { %3359 = vmatpush3.msra.mxu0 %v2365_v37 }
0x12e7   :  { %3360 = vmatprep.subr.mxu0 %v2364_v43 }
0x12e8   :  { %3361 = vmatpush3.msra.mxu0 %v2364_v43 }
0x12e9   :  { %3362 = vmatprep.subr.mxu0 %v2363_v32 }
0x12ea   :  { %3363 = vmatpush3.msra.mxu0 %v2363_v32 }
0x12eb   :  { %3364 = vmatprep.subr.mxu0 %v2362_v33 }
0x12ec   :  { %3365 = vmatpush3.msra.mxu0 %v2362_v33  ;;  %v2586_v33 = vld [vmem:[#allocation2 + $0x118] sm:$0xff] }
0x12ed   :  { %3366 = vmatprep.subr.mxu0 %v2361_v13 }
0x12ee   :  { %3367 = vmatpush3.msra.mxu0 %v2361_v13  ;;  %v2585_v13 = vld [vmem:[#allocation2 + $0x110] sm:$0xff] }
0x12ef   :  { %3368 = vmatprep.subr.mxu0 %v2360_v18 }
0x12f0   :  { %3369 = vmatpush3.msra.mxu0 %v2360_v18  ;;  %v2584_v18 = vld [vmem:[#allocation2 + $0x108] sm:$0xff] }
0x12f1   :  { %3370 = vmatprep.subr.mxu0 %v2359_v42 }
0x12f2   :  { %3371 = vmatpush3.msra.mxu0 %v2359_v42 }
0x12f3   :  { %3421 = vmatprep.subr.mxu0 %v3555_v1 }
0x13a3   :  { %v3344_v47 = vpop.f32.mrf.mxu0 }
0x13a4   :  { %v2222_v25 = vadd.f32 %v3344_v47, %v2861_v58 }
0x13a5   :  { %v2216_v57 = vpop.f32.mrf.mxu0 }
0x13a6   :  { %v2217_v23 = vadd.f32 %v2861_v58, %v2216_v57  ;;  %v2226_v45 = vadd.f32 %v2222_v25, %v3892_v17 }
0x13a8   :  { %v2232_v12 = vsel %vm147_vm8, %v2226_v45, 0.0  ;;  %v2225_v22 = vadd.f32 %v2217_v23, %v3890_v14  ;;  %v2269_v14 = vld [vmem:[#allocation2 + $0x318] sm:$0xff] }
0x13a9   :  { %2233 = vadd.xlane.f32.xlu0 %v2232_v12  ;;  %3347 = vmatprep.subr.mxu1 %v2269_v14 }
0x13aa   :  { %v2229_v52 = vsel %vm147_vm8, %v2225_v22, 0.0  ;;  %3348 = vmatpush3.msra.mxu1 %v2269_v14 }
0x13ab   :  { %2230 = vadd.xlane.f32.xlu1 %v2229_v52  ;;  %3349 = vmatprep.subr.mxu1 %v2268_v31 }
0x13ac   :  { %3350 = vmatpush3.msra.mxu1 %v2268_v31 }
0x13ad   :  { %3351 = vmatprep.subr.mxu1 %v2267_v48 }
0x13ae   :  { %3352 = vmatpush3.msra.mxu1 %v2267_v48  ;;  %v2872_v48 = vld [vmem:[#allocation2 + $0x378] ss:$0 sm:$0xff] }
0x1432   :  { %v2234_v44 = vpop.xlane.xlu0 %2233 }
0x1433   :  { %v2236_v51 = vmul.f32 0.03125, %v2234_v44 }
0x1434   :  { %v2231_v3 = vpop.xlane.xlu1 %2230 }
0x1435   :  { %v2238_v55 = vsub.f32 %v2226_v45, %v2236_v51  ;;  %v2235_v34 = vmul.f32 0.03125, %v2231_v3  ;;  %v2498_v51 = vld [vmem:[#allocation2 + $0x100] sm:$0xff]  ;;  %v2497_v3 = vld [vmem:[#allocation2 + $0xf8] sm:$0xff] }
0x1436   :  { %3375 = vmatprep.subr.mxu1 %v2498_v51 }
0x1437   :  { %v2237_v21 = vsub.f32 %v2225_v22, %v2235_v34  ;;  %v2240_v59 = vmul.f32 %v2238_v55, %v2238_v55  ;;  %v2495_v34 = vld [vmem:[#allocation2 + $0xe8] sm:$0xff] }
0x1439   :  { %v2244_v50 = vsel %vm147_vm8, %v2240_v59, 0.0  ;;  %v2239_v53 = vmul.f32 %v2237_v21, %v2237_v21 }
0x143a   :  { %2245 = vadd.xlane.f32.xlu1 %v2244_v50 }
0x143b   :  { %v2241_v17 = vsel %vm147_vm8, %v2239_v53, 0.0 }
0x143c   :  { %2242 = vadd.xlane.f32.xlu0 %v2241_v17 }
0x14c3   :  { %v2246_v38 = vpop.xlane.xlu1 %2245 }
0x14c4   :  { %v2248_v61 = vmul.f32 0.03125, %v2246_v38  ;;  %v2873_v38 = vld [vmem:[#allocation2 + $0x380] ss:$0 sm:$0xff] }
0x14c5   :  { %v2243_v49 = vpop.xlane.xlu0 %2242 }
0x14c6   :  { %v2250_v54 = vadd.f32 1e-05, %v2248_v61  ;;  %v2247_v20 = vmul.f32 0.03125, %v2243_v49 }
0x14c8   :  { %3517 = vrsqrt.f32 %v2250_v54  ;;  %v2249_v4 = vadd.f32 1e-05, %v2247_v20  ;;  %v2598_v20 = vld [vmem:[#allocation2 + $0x178] sm:$0xff] }
0x14ca   :  { %3519 = vrsqrt.f32 %v2249_v4  ;;  %v2597_v4 = vld [vmem:[#allocation2 + $0x170] sm:$0xff] }
0x14d5   :  { %v3518_v60 = vpop.eup %3517 }
0x14d6   :  { %v2254_v62 = vmul.f32 %v3518_v60, %v2238_v55  ;;  %v2496_v55 = vld [vmem:[#allocation2 + $0xf0] sm:$0xff]  ;;  %v2596_v60 = vld [vmem:[#allocation2 + $0x168] sm:$0xff] }
0x14d7   :  { %v3520_v5 = vpop.eup %3519 }
0x14d8   :  { %v2253_v8 = vmul.f32 %v3520_v5, %v2237_v21  ;;  %v2260_v9 = vmul.f32 %v2864_v10, %v2254_v62  ;;  %v2599_v21 = vld [vmem:[#allocation2 + $0x180] sm:$0xff]  ;;  %v2594_v62 = vld [vmem:[#allocation2 + $0x158] sm:$0xff]  ;;  %v2593_v5 = vld [vmem:[#allocation2 + $0x150] sm:$0xff] }
0x14da   :  { %v2259_v29 = vmul.f32 %v2864_v10, %v2253_v8  ;;  %v2266_v63 = vadd.f32 %v2865_v11, %v2260_v9  ;;  %v2595_v10 = vld [vmem:[#allocation2 + $0x160] sm:$0xff]  ;;  %v2592_v8 = vld [vmem:[#allocation2 + $0x148] sm:$0xff] }
0x14db   :  { %v2591_v9 = vld [vmem:[#allocation2 + $0x140] sm:$0xff] }
0x14dc   :  { %v2265_v6 = vadd.f32 %v2865_v11, %v2259_v29  ;;  %v2590_v11 = vld [vmem:[#allocation2 + $0x138] sm:$0xff]  ;;  %v2589_v29 = vld [vmem:[#allocation2 + $0x130] sm:$0xff] }
0x14de   :  { %3353 = vmatprep.mubr.msk.f32.mxu1 %vm147_vm8, %v2265_v6 }
0x14df   :  { %3354 = vmatmul.mubr.msk.f32.vlgmr.msra.gmra.mxu1 %vm147_vm8, %v2266_v63 }
0x14e0   :  { %3376 = vmatpush3.msra.mxu1 %v2498_v51 }
0x14e1   :  { %3377 = vmatprep.subr.mxu1 %v2497_v3 }
0x14e2   :  { %3378 = vmatpush3.msra.mxu1 %v2497_v3 }
0x14e3   :  { %3379 = vmatprep.subr.mxu1 %v2496_v55 }
0x14e4   :  { %3380 = vmatpush3.msra.mxu1 %v2496_v55 }
0x14e5   :  { %3381 = vmatprep.subr.mxu1 %v2495_v34 }
0x14e6   :  { %3382 = vmatpush3.msra.mxu1 %v2495_v34 }
0x14e7   :  { %3386 = vmatprep.subr.mxu1 %v2599_v21 }
0x159f   :  { %v3355_v35 = vpop.f32.mrf.mxu1 }
0x15a0   :  { %v2354_v7 = vadd.f32 %v3355_v35, %v2866_v39  ;;  %v2581_v35 = vld [vmem:[#allocation2 + $0x198] sm:$0xff] }
0x15a1   :  { %v2348_v16 = vpop.f32.mrf.mxu1 }
0x15a2   :  { %v2349_v46 = vadd.f32 %v2866_v39, %v2348_v16  ;;  %v2358_v30 = vmax.f32 %v2354_v7, 0.0  ;;  %v2580_v39 = vld [vmem:[#allocation2 + $0x190] sm:$0xff] }
0x15a4   :  { %v2357_v0 = vmax.f32 %v2349_v46, 0.0 }
0x15a6   :  { %3372 = vmatprep.mubr.msk.f32.mxu0 %vm740_vm11, %v2357_v0 }
0x15a7   :  { %3373 = vmatmul.mubr.msk.f32.vlgmr.msra.gmra.mxu0 %vm740_vm11, %v2358_v30  ;;  %v2675_v30 = vld [vmem:[#allocation2 + $0x188] sm:$0xff] }
0x15a8   :  { %3425 = vmatprep.mubr.msk.f32.mxu0 %vm3557_vm9, %v3555_v1 }
0x1667   :  { %v3374_v56 = vpop.f32.mrf.mxu0 }
0x1668   :  { %v2450_v40 = vadd.f32 %v3374_v56, %v2869_v41  ;;  %v2876_v56 = vld [vmem:[#allocation2 + $0x1c0] ss:$0 sm:$0xff] }
0x1669   :  { %v2444_v19 = vpop.f32.mrf.mxu0 }
0x166a   :  { %v2445_v28 = vadd.f32 %v2869_v41, %v2444_v19  ;;  %v2454_v26 = vadd.f32 %v2450_v40, %v2266_v63  ;;  %v2587_v63 = vld [vmem:[#allocation2 + $0x120] sm:$0xff] }
0x166c   :  { %v2460_v27 = vsel %vm147_vm8, %v2454_v26, 0.0  ;;  %v2453_v24 = vadd.f32 %v2445_v28, %v2265_v6  ;;  %v2588_v6 = vld [vmem:[#allocation2 + $0x128] sm:$0xff] }
0x166d   :  { %2461 = vadd.xlane.f32.xlu1 %v2460_v27 }
0x166e   :  { %v2457_v36 = vsel %vm147_vm8, %v2453_v24, 0.0 }
0x166f   :  { %2458 = vadd.xlane.f32.xlu0 %v2457_v36 }
0x16f6   :  { %v2462_v58 = vpop.xlane.xlu1 %2461 }
0x16f7   :  { %v2464_v47 = vmul.f32 0.03125, %v2462_v58 }
0x16f8   :  { %v2459_v25 = vpop.xlane.xlu0 %2458 }
0x16f9   :  { %v2466_v57 = vsub.f32 %v2454_v26, %v2464_v47  ;;  %v2463_v23 = vmul.f32 0.03125, %v2459_v25 }
0x16fb   :  { %v2465_v45 = vsub.f32 %v2453_v24, %v2463_v23  ;;  %v2468_v12 = vmul.f32 %v2466_v57, %v2466_v57 }
0x16fd   :  { %v2472_v22 = vsel %vm147_vm8, %v2468_v12, 0.0  ;;  %v2467_v52 = vmul.f32 %v2465_v45, %v2465_v45 }
0x16fe   :  { %2473 = vadd.xlane.f32.xlu1 %v2472_v22 }
0x16ff   :  { %v2469_v44 = vsel %vm147_vm8, %v2467_v52, 0.0 }
0x1700   :  { %2470 = vadd.xlane.f32.xlu0 %v2469_v44 }
0x1787   :  { %v2474_v59 = vpop.xlane.xlu1 %2473 }
0x1788   :  { %v2476_v50 = vmul.f32 0.03125, %v2474_v59 }
0x1789   :  { %v2471_v53 = vpop.xlane.xlu0 %2470 }
0x178a   :  { %v2478_v17 = vadd.f32 1e-05, %v2476_v50  ;;  %v2475_v2 = vmul.f32 0.03125, %v2471_v53 }
0x178c   :  { %3521 = vrsqrt.f32 %v2478_v17  ;;  %v2477_v14 = vadd.f32 1e-05, %v2475_v2 }
0x178e   :  { %3523 = vrsqrt.f32 %v2477_v14 }
0x1799   :  { %v3522_v31 = vpop.eup %3521 }
0x179a   :  { %v2482_v15 = vmul.f32 %v3522_v31, %v2466_v57 }
0x179b   :  { %v3524_v37 = vpop.eup %3523 }
0x179c   :  { %v2481_v43 = vmul.f32 %v3524_v37, %v2465_v45  ;;  %v2488_v32 = vmul.f32 %v2872_v48, %v2482_v15 }
0x179e   :  { %v2487_v61 = vmul.f32 %v2872_v48, %v2481_v43  ;;  %v2494_v54 = vadd.f32 %v2873_v38, %v2488_v32 }
0x17a0   :  { %v2493_v49 = vadd.f32 %v2873_v38, %v2487_v61 }
0x17a2   :  { %3383 = vmatprep.mubr.msk.f32.mxu1 %vm147_vm8, %v2493_v49 }
0x17a3   :  { %3384 = vmatmul.mubr.msk.f32.vlgmr.msra.gmra.mxu1 %vm147_vm8, %v2494_v54 }
0x17a4   :  { %3387 = vmatpush3.msra.mxu1 %v2599_v21 }
0x17a5   :  { %3388 = vmatprep.subr.mxu1 %v2598_v20 }
0x17a6   :  { %3389 = vmatpush3.msra.mxu1 %v2598_v20 }
0x17a7   :  { %3390 = vmatprep.subr.mxu1 %v2597_v4 }
0x17a8   :  { %3391 = vmatpush3.msra.mxu1 %v2597_v4 }
0x17a9   :  { %3392 = vmatprep.subr.mxu1 %v2596_v60 }
0x17aa   :  { %3393 = vmatpush3.msra.mxu1 %v2596_v60 }
0x17ab   :  { %3394 = vmatprep.subr.mxu1 %v2595_v10 }
0x17ac   :  { %3395 = vmatpush3.msra.mxu1 %v2595_v10 }
0x17ad   :  { %3396 = vmatprep.subr.mxu1 %v2594_v62 }
0x17ae   :  { %3397 = vmatpush3.msra.mxu1 %v2594_v62 }
0x17af   :  { %3398 = vmatprep.subr.mxu1 %v2593_v5 }
0x17b0   :  { %3399 = vmatpush3.msra.mxu1 %v2593_v5 }
0x17b1   :  { %3400 = vmatprep.subr.mxu1 %v2592_v8 }
0x17b2   :  { %3401 = vmatpush3.msra.mxu1 %v2592_v8 }
0x17b3   :  { %3402 = vmatprep.subr.mxu1 %v2591_v9 }
0x17b4   :  { %3403 = vmatpush3.msra.mxu1 %v2591_v9 }
0x17b5   :  { %3404 = vmatprep.subr.mxu1 %v2590_v11 }
0x17b6   :  { %3405 = vmatpush3.msra.mxu1 %v2590_v11 }
0x17b7   :  { %3406 = vmatprep.subr.mxu1 %v2589_v29 }
0x17b8   :  { %3407 = vmatpush3.msra.mxu1 %v2589_v29 }
0x17b9   :  { %3408 = vmatprep.subr.mxu1 %v2588_v6 }
0x17ba   :  { %3409 = vmatpush3.msra.mxu1 %v2588_v6 }
0x17bb   :  { %3410 = vmatprep.subr.mxu1 %v2587_v63 }
0x17bc   :  { %3411 = vmatpush3.msra.mxu1 %v2587_v63 }
0x17bd   :  { %3412 = vmatprep.subr.mxu1 %v2586_v33 }
0x17be   :  { %3413 = vmatpush3.msra.mxu1 %v2586_v33 }
0x17bf   :  { %3414 = vmatprep.subr.mxu1 %v2585_v13 }
0x17c0   :  { %3415 = vmatpush3.msra.mxu1 %v2585_v13 }
0x17c1   :  { %3416 = vmatprep.subr.mxu1 %v2584_v18 }
0x17c2   :  { %3417 = vmatpush3.msra.mxu1 %v2584_v18 }
0x1863   :  { %v3385_v42 = vpop.f32.mrf.mxu1 }
0x1864   :  { %v2583_v46 = vmul.f32 %v3385_v42, %v2581_v35 }
0x1865   :  { %v2571_v7 = vpop.f32.mrf.mxu1 }
0x1866   :  { %v2582_v16 = vmul.f32 %v2580_v39, %v2571_v7 }
0x1868   :  { %3418 = vmatprep.mubr.f32.mxu1 %v2582_v16 }
0x1869   :  { %3419 = vmatmul.mubr.f32.vlgmr.msra.gmra.mxu1 %v2583_v46 }
0x1929   :  { %v3420_v0 = vpop.f32.mrf.mxu1 }
0x192a   :  { %3422 = vmatpush3.msra.mxu0 %v3420_v0 }
0x192b   :  { %v2666_v41 = vpop.f32.mrf.mxu1  ;;  %3423 = vmatprep.subr.mxu0 %v3555_v1 }
0x192c   :  { %3424 = vmatpush3.msra.mxu0 %v2666_v41 }
0x192d   :  { %3426 = vmatmul.mubr.msk.f32.vlgmr.msra.gmra.mxu0 %vm210_vm10, %v2675_v30 }
0x19ed   :  { %v2750_v40 = vpop.f32.mrf.mxu0 }
0x19ee   :  { %v2751_v19 = vadd.f32 %v2876_v56, %v2750_v40 }
0x19ef   :  { %v3427_v28 = vpop.f32.mrf.mxu0 }
0x19f0   :  { %v2754_v26 = vmul.f32 %v2751_v19, %v2751_v19 }
0x19f2   :  { %2755 = vadd.xlane.f32.xlu0 %v2754_v26 }
0x1a7b   :  { %v2756_v27 = vpop.xlane.xlu0 %2755 }
0x1a7c   :  { %v2757_v24 = vmax.f32 %v2756_v27, 1e-24 }
0x1a7e   :  { %3525 = vrsqrt.f32 %v2757_v24 }
0x1a8b   :  { %v3526_v36 = vpop.eup %3525 }
0x1a8c   :  { %v2759_v58 = vmul.f32 %v3526_v36, %v2751_v19 }
0x1a8e   :  { %2760 = vst [vmem:[%s4081_s3] sm:$0xff] %v2759_v58 }
0x1a8f   :  { %2765 = vsyncpa [#allocation3], 1 }

</bundles_post_ra>
